<compile_context>
chip_gen: v6e
topology: v6e:2x2x1
jax: 0.10.0
libtpu: 0.0.40
codegen_flags: <defaults>
</compile_context>

<pallas_src>
import functools
import math

import jax
import jax.numpy as jnp
from jax.experimental import pallas as pl
from jax.experimental.pallas import tpu as pltpu

EPS = 1e-5                     # PyTorch LayerNorm default
NEG_INF = -1e30                # additive mask for padded key positions
MATMUL_DTYPE = jnp.bfloat16    # MXU input dtype (accumulation is always f32)


def _round_up(x, m):
    return (x + m - 1) // m * m


# ----------------------------------------------------------------------------
# In-kernel helpers (pure jnp, traced inside the Pallas kernel, f32 math)
# ----------------------------------------------------------------------------
def _layernorm(x, w, b):
    mu = jnp.mean(x, axis=-1, keepdims=True)
    var = jnp.mean((x - mu) ** 2, axis=-1, keepdims=True)
    return (x - mu) * jax.lax.rsqrt(var + EPS) * w + b


def _gelu_exact(x):
    # torch F.gelu default for activation='gelu' (erf-based, exact)
    return 0.5 * x * (1.0 + jax.lax.erf(x / math.sqrt(2.0)))


# ----------------------------------------------------------------------------
# Fused TinyViT kernel: patch-embed (step 0) + L encoder layers + head (last)
# ----------------------------------------------------------------------------
def _tinyvit_kernel(patches_ref, proj_w_ref, proj_b_ref, init_bias_ref,
                    wqkv_ref, bqkv_ref, wo_ref, bo_ref,
                    ln1w_ref, ln1b_ref, w1_ref, b1_ref,
                    w2_ref, b2_ref, ln2w_ref, ln2b_ref,
                    norm_w_ref, norm_b_ref, cls_w_ref, cls_b_ref,
                    out_ref, xs_ref,
                    *, B, S, S_real, NP, E, num_heads, mm_dt):
    l = pl.program_id(0)
    dh = E // num_heads
    scale = 1.0 / math.sqrt(dh)

    # ---- grid step 0: patch embedding + CLS token + positional embedding ---
    @pl.when(l == 0)
    def _():
        emb = jnp.dot(patches_ref[...], proj_w_ref[...],
                      preferred_element_type=jnp.float32) + proj_b_ref[...]
        emb = emb.reshape(B, NP, E)
        parts = [jnp.zeros((B, 1, E), jnp.float32), emb]   # CLS slot is row 0
        if S > S_real:                                     # zero rows -> pad
            parts.append(jnp.zeros((B, S - S_real, E), jnp.float32))
        # init_bias row 0 already contains cls_token + pos_embed[0]
        xs_ref[...] = jnp.concatenate(parts, axis=1) + init_bias_ref[...]

    # ---- one post-norm TransformerEncoderLayer on the whole batch ----------
    x2d = xs_ref[...].reshape(B * S, E)                    # (B*S, E) f32

    # fused QKV projection: single fat GEMM over all batch*seq rows
    qkv = jnp.dot(x2d.astype(mm_dt), wqkv_ref[0],
                  preferred_element_type=jnp.float32) + bqkv_ref[0]
    qkv3 = qkv.reshape(B, S, 3 * E).astype(mm_dt)          # (B, S, 3E)

    # additive key mask so padded sequence slots never receive weight
    kidx = jax.lax.broadcasted_iota(jnp.int32, (1, 1, S), 2)
    key_mask = jnp.where(kidx < S_real, 0.0, NEG_INF).astype(jnp.float32)

    # per-head attention (static unroll); per-head outputs are concatenated on
    # the lane axis and pushed through ONE (B*S,E)@(E,E) output projection.
    o_parts = []
    for h in range(num_heads):
        qh = qkv3[:, :, h * dh:(h + 1) * dh]
        kh = qkv3[:, :, E + h * dh:E + (h + 1) * dh]
        vh = qkv3[:, :, 2 * E + h * dh:2 * E + (h + 1) * dh]
        s = jnp.einsum('bqd,bkd->bqk', qh, kh,
                       preferred_element_type=jnp.float32) * scale + key_mask
        s = s - jnp.max(s, axis=-1, keepdims=True)
        p = jnp.exp(s)
        p = p * pl.reciprocal(jnp.sum(p, axis=-1, keepdims=True), approx=True)
        o_parts.append(jnp.einsum('bqk,bkd->bqd', p.astype(mm_dt), vh,
                                  preferred_element_type=jnp.float32))
    o_cat = jnp.concatenate(o_parts, axis=-1).reshape(B * S, E)
    attn = jnp.dot(o_cat.astype(mm_dt), wo_ref[0],
                   preferred_element_type=jnp.float32) + bo_ref[0]
    # dropout1 is identity in eval mode

    x1 = _layernorm(x2d + attn, ln1w_ref[0], ln1b_ref[0])

    # feed-forward block, again one fat GEMM pair over (B*S, .)
    h1 = jnp.dot(x1.astype(mm_dt), w1_ref[0],
                 preferred_element_type=jnp.float32) + b1_ref[0]
    h1 = _gelu_exact(h1)
    ff = jnp.dot(h1.astype(mm_dt), w2_ref[0],
                 preferred_element_type=jnp.float32) + b2_ref[0]
    # dropout2 is identity in eval mode

    x2 = _layernorm(x1 + ff, ln2w_ref[0], ln2b_ref[0])
    xs_ref[...] = x2.reshape(B, S, E)

    # ---- last grid step: final LayerNorm on CLS token + classifier ---------
    @pl.when(l == pl.num_programs(0) - 1)
    def _():
        cls_tok = xs_ref[:, 0, :]                          # (B, E)
        cls_n = _layernorm(cls_tok, norm_w_ref[...], norm_b_ref[...])
        logits = jnp.dot(cls_n.astype(mm_dt), cls_w_ref[...],
                         preferred_element_type=jnp.float32) + cls_b_ref[...]
        out_ref[...] = logits.astype(out_ref.dtype)


# ----------------------------------------------------------------------------
# Forward wrapper: patch extraction glue + one fused pallas_call
# ----------------------------------------------------------------------------
def tiny_vit_forward(x, packed, cfg):
    B, C, H, W = x.shape
    P = cfg["patch_size"]
    E = cfg["embed_dim"]
    M = cfg["mlp_dim"]
    L = cfg["num_layers"]
    NC = cfg["num_classes"]
    nH, nW = H // P, W // P
    NP = nH * nW
    S_real = NP + 1
    S = _round_up(S_real, 8)
    PD = P * P * C

    # Patch extraction (matches torch unfold/permute/view order: (ph, pw, c))
    patches = (x.reshape(B, C, nH, P, nW, P)
                 .transpose(0, 2, 4, 3, 5, 1)
                 .reshape(B * NP, PD)
                 .astype(MATMUL_DTYPE))

    kernel = functools.partial(
        _tinyvit_kernel, B=B, S=S, S_real=S_real, NP=NP, E=E,
        num_heads=cfg["num_heads"], mm_dt=MATMUL_DTYPE)

    lmap3 = lambda l: (l, 0, 0)     # per-layer stacked weights (streamed)
    c2 = lambda l: (0, 0)           # layer-invariant 2-D inputs (fetched once)
    c3 = lambda l: (0, 0, 0)        # layer-invariant 3-D inputs (fetched once)

    in_specs = [
        pl.BlockSpec((B * NP, PD), c2),        # patches
        pl.BlockSpec((PD, E), c2),             # proj_w (pre-transposed)
        pl.BlockSpec((1, E), c2),              # proj_b
        pl.BlockSpec((1, S, E), c3),           # init_bias (cls + pos, padded)
        pl.BlockSpec((1, E, 3 * E), lmap3),    # wqkv
        pl.BlockSpec((1, 1, 3 * E), lmap3),    # bqkv
        pl.BlockSpec((1, E, E), lmap3),        # wo
        pl.BlockSpec((1, 1, E), lmap3),        # bo
        pl.BlockSpec((1, 1, E), lmap3),        # ln1w
        pl.BlockSpec((1, 1, E), lmap3),        # ln1b
        pl.BlockSpec((1, E, M), lmap3),        # w1
        pl.BlockSpec((1, 1, M), lmap3),        # b1
        pl.BlockSpec((1, M, E), lmap3),        # w2
        pl.BlockSpec((1, 1, E), lmap3),        # b2
        pl.BlockSpec((1, 1, E), lmap3),        # ln2w
        pl.BlockSpec((1, 1, E), lmap3),        # ln2b
        pl.BlockSpec((1, E), c2),              # final norm_w
        pl.BlockSpec((1, E), c2),              # final norm_b
        pl.BlockSpec((E, NC), c2),             # classifier W (pre-transposed)
        pl.BlockSpec((1, NC), c2),             # classifier b
    ]

    return pl.pallas_call(
        kernel,
        out_shape=jax.ShapeDtypeStruct((B, NC), jnp.float32),
        grid=(L,),
        in_specs=in_specs,
        out_specs=pl.BlockSpec((B, NC), c2),
        scratch_shapes=[pltpu.VMEM((B, S, E), jnp.float32)],  # resident acts
        compiler_params=pltpu.CompilerParams(
            dimension_semantics=("arbitrary",)),
    )(patches, packed["proj_w"], packed["proj_b"], packed["init_bias"],
      packed["wqkv"], packed["bqkv"], packed["wo"], packed["bo"],
      packed["ln1w"], packed["ln1b"], packed["w1"], packed["b1"],
      packed["w2"], packed["b2"], packed["ln2w"], packed["ln2b"],
      packed["norm_w"], packed["norm_b"], packed["cls_w"], packed["cls_b"])


# ----------------------------------------------------------------------------
# Deterministic PyTorch-layout parameters + host-side packing for the kernel
# ----------------------------------------------------------------------------
def make_params(key, cfg):
    C, P, E, M = cfg["in_chans"], cfg["patch_size"], cfg["embed_dim"], cfg["mlp_dim"]
    NP = (cfg["img_size"] // P) ** 2
    PD = P * P * C
    NC = cfg["num_classes"]

    def nrm(k, shape, std=0.02):
        return (std * jax.random.normal(k, shape)).astype(jnp.float32)

    keys = jax.random.split(key, 8 + cfg["num_layers"])
    params = {
        "proj_w": nrm(keys[0], (E, PD)),            # torch nn.Linear layout
        "proj_b": jnp.zeros((E,), jnp.float32),
        "cls_token": nrm(keys[1], (1, 1, E)),
        "pos_embed": nrm(keys[2], (1, NP + 1, E)),
        "norm_w": jnp.ones((E,), jnp.float32),
        "norm_b": jnp.zeros((E,), jnp.float32),
        "cls_w": nrm(keys[3], (NC, E)),
        "cls_b": jnp.zeros((NC,), jnp.float32),
        "layers": [],
    }
    for li in range(cfg["num_layers"]):
        lk = jax.random.split(keys[8 + li], 4)
        params["layers"].append({
            "wqkv": nrm(lk[0], (3 * E, E)),
            "bqkv": jnp.zeros((3 * E,), jnp.float32),
            "wo": nrm(lk[1], (E, E)),
            "bo": jnp.zeros((E,), jnp.float32),
            "ln1w": jnp.ones((E,), jnp.float32),
            "ln1b": jnp.zeros((E,), jnp.float32),
            "w1": nrm(lk[2], (M, E)),
            "b1": jnp.zeros((M,), jnp.float32),
            "w2": nrm(lk[3], (E, M)),
            "b2": jnp.zeros((E,), jnp.float32),
            "ln2w": jnp.ones((E,), jnp.float32),
            "ln2b": jnp.zeros((E,), jnp.float32),
        })
    return params


def pack_params(params, cfg):
    """Host-side prep: transpose weights to (in,out), cast big mats to bf16,
    stack per-layer tensors along a leading layer axis, fold cls+pos bias."""
    S_real = (cfg["img_size"] // cfg["patch_size"]) ** 2 + 1
    S = _round_up(S_real, 8)

    def stack_w(name):   # torch (out, in) -> (L, in, out), MXU dtype
        return jnp.stack([lp[name].T for lp in params["layers"]]
                         ).astype(MATMUL_DTYPE)

    def stack_v(name):   # torch (dim,) -> (L, 1, dim), f32
        return jnp.stack([lp[name].reshape(1, -1) for lp in params["layers"]])

    # row 0 = cls_token + pos_embed[0]; rows 1..NP = pos_embed[1..]; pad = 0
    seq_bias = params["pos_embed"].at[:, 0:1, :].add(params["cls_token"])
    init_bias = jnp.pad(seq_bias, ((0, 0), (0, S - S_real), (0, 0)))

    return {
        "proj_w": params["proj_w"].T.astype(MATMUL_DTYPE),
        "proj_b": params["proj_b"].reshape(1, -1),
        "init_bias": init_bias,
        "wqkv": stack_w("wqkv"), "bqkv": stack_v("bqkv"),
        "wo": stack_w("wo"), "bo": stack_v("bo"),
        "ln1w": stack_v("ln1w"), "ln1b": stack_v("ln1b"),
        "w1": stack_w("w1"), "b1": stack_v("b1"),
        "w2": stack_w("w2"), "b2": stack_v("b2"),
        "ln2w": stack_v("ln2w"), "ln2b": stack_v("ln2b"),
        "norm_w": params["norm_w"].reshape(1, -1),
        "norm_b": params["norm_b"].reshape(1, -1),
        "cls_w": params["cls_w"].T.astype(MATMUL_DTYPE),
        "cls_b": params["cls_b"].reshape(1, -1),
    }


if __name__ == "__main__":
    cfg = dict(num_classes=10, embed_dim=32, img_size=16, patch_size=4,
               in_chans=4, num_heads=4, num_layers=2, mlp_dim=64)

    key = jax.random.PRNGKey(0)
    k_x, k_p = jax.random.split(key)
    x = jax.random.normal(k_x, (2, cfg["in_chans"], cfg["img_size"],
                                cfg["img_size"]), dtype=jnp.float32)
    params = make_params(k_p, cfg)
    packed = pack_params(params, cfg)

    fwd = jax.jit(functools.partial(tiny_vit_forward, cfg=cfg))
    logits = fwd(x, packed)
    jax.block_until_ready(logits)
    assert logits.shape == (2, cfg["num_classes"])
    assert bool(jnp.all(jnp.isfinite(logits)))
    print("KERNEL_OK")
</pallas_src>

<mosaic_0001>
module attributes {stable_mosaic.version = 11 : i64} {
  func.func @_tinyvit_kernel(%arg0: i32, %arg1: memref<32x64xbf16, #tpu.memory_space<vmem>>, %arg2: memref<64x32xbf16, #tpu.memory_space<vmem>>, %arg3: memref<1x32xf32, #tpu.memory_space<vmem>>, %arg4: memref<1x24x32xf32, #tpu.memory_space<vmem>>, %arg5: memref<1x32x96xbf16, #tpu.memory_space<vmem>>, %arg6: memref<1x1x96xf32, #tpu.memory_space<vmem>>, %arg7: memref<1x32x32xbf16, #tpu.memory_space<vmem>>, %arg8: memref<1x1x32xf32, #tpu.memory_space<vmem>>, %arg9: memref<1x1x32xf32, #tpu.memory_space<vmem>>, %arg10: memref<1x1x32xf32, #tpu.memory_space<vmem>>, %arg11: memref<1x32x64xbf16, #tpu.memory_space<vmem>>, %arg12: memref<1x1x64xf32, #tpu.memory_space<vmem>>, %arg13: memref<1x64x32xbf16, #tpu.memory_space<vmem>>, %arg14: memref<1x1x32xf32, #tpu.memory_space<vmem>>, %arg15: memref<1x1x32xf32, #tpu.memory_space<vmem>>, %arg16: memref<1x1x32xf32, #tpu.memory_space<vmem>>, %arg17: memref<1x32xf32, #tpu.memory_space<vmem>>, %arg18: memref<1x32xf32, #tpu.memory_space<vmem>>, %arg19: memref<32x10xbf16, #tpu.memory_space<vmem>>, %arg20: memref<1x10xf32, #tpu.memory_space<vmem>>, %arg21: memref<2x10xf32, #tpu.memory_space<vmem>>, %arg22: memref<2x24x32xf32, #tpu.memory_space<vmem>>) attributes {dimension_semantics = [#tpu.dimension_semantics<arbitrary>], iteration_bounds = array<i64: 2>, scalar_prefetch = 0 : i64, scratch_operands = 1 : i64, tpu.core_type = #tpu.core_type<tc>, window_params = [{pipeline_mode = #tpu.pipeline_mode<synchronous>, transform_indices = @transform_0, window_bounds = array<i64: 32, 64>}, {pipeline_mode = #tpu.pipeline_mode<synchronous>, transform_indices = @transform_1, window_bounds = array<i64: 64, 32>}, {pipeline_mode = #tpu.pipeline_mode<synchronous>, transform_indices = @transform_2, window_bounds = array<i64: 1, 32>}, {pipeline_mode = #tpu.pipeline_mode<synchronous>, transform_indices = @transform_3, window_bounds = array<i64: 1, 24, 32>}, {transform_indices = @transform_4, window_bounds = array<i64: 1, 32, 96>}, {transform_indices = @transform_5, window_bounds = array<i64: 1, 1, 96>}, {transform_indices = @transform_6, window_bounds = array<i64: 1, 32, 32>}, {transform_indices = @transform_7, window_bounds = array<i64: 1, 1, 32>}, {transform_indices = @transform_8, window_bounds = array<i64: 1, 1, 32>}, {transform_indices = @transform_9, window_bounds = array<i64: 1, 1, 32>}, {transform_indices = @transform_10, window_bounds = array<i64: 1, 32, 64>}, {transform_indices = @transform_11, window_bounds = array<i64: 1, 1, 64>}, {transform_indices = @transform_12, window_bounds = array<i64: 1, 64, 32>}, {transform_indices = @transform_13, window_bounds = array<i64: 1, 1, 32>}, {transform_indices = @transform_14, window_bounds = array<i64: 1, 1, 32>}, {transform_indices = @transform_15, window_bounds = array<i64: 1, 1, 32>}, {pipeline_mode = #tpu.pipeline_mode<synchronous>, transform_indices = @transform_16, window_bounds = array<i64: 1, 32>}, {pipeline_mode = #tpu.pipeline_mode<synchronous>, transform_indices = @transform_17, window_bounds = array<i64: 1, 32>}, {pipeline_mode = #tpu.pipeline_mode<synchronous>, transform_indices = @transform_18, window_bounds = array<i64: 32, 10>}, {pipeline_mode = #tpu.pipeline_mode<synchronous>, transform_indices = @transform_19, window_bounds = array<i64: 1, 10>}, {pipeline_mode = #tpu.pipeline_mode<synchronous>, transform_indices = @transform_20, window_bounds = array<i64: 2, 10>}]} {
    %c0_i32 = arith.constant 0 : i32
    %0 = arith.cmpi eq, %arg0, %c0_i32 : i32
    %1 = arith.extui %0 : i1 to i32
    %c0_i32_0 = arith.constant 0 : i32
    %2 = arith.cmpi ne, %1, %c0_i32_0 : i32
    scf.if %2 {
      %c0_81 = arith.constant 0 : index
      %c0_82 = arith.constant 0 : index
      %194 = vector.load %arg1[%c0_81, %c0_82] : memref<32x64xbf16, #tpu.memory_space<vmem>>, vector<32x64xbf16>
      %c0_83 = arith.constant 0 : index
      %c0_84 = arith.constant 0 : index
      %195 = vector.load %arg2[%c0_83, %c0_84] : memref<64x32xbf16, #tpu.memory_space<vmem>>, vector<64x32xbf16>
      %cst_85 = arith.constant dense<0.000000e+00> : vector<32x32xf32>
      %196 = tpu.matmul %194, %195, %cst_85 {dimension_numbers = #tpu.dot_dimension_numbers<[1], [0], [0], [1], [0, 0, 1, 1], [], []>} : vector<32x64xbf16>, vector<64x32xbf16>, vector<32x32xf32> -> vector<32x32xf32>
      %c0_86 = arith.constant 0 : index
      %c0_87 = arith.constant 0 : index
      %197 = vector.load %arg3[%c0_86, %c0_87] : memref<1x32xf32, #tpu.memory_space<vmem>>, vector<1x32xf32>
      %198 = vector.broadcast %197 : vector<1x32xf32> to vector<32x32xf32>
      %199 = arith.addf %196, %198 : vector<32x32xf32>
      %200 = vector.shape_cast %199 : vector<32x32xf32> to vector<2x16x32xf32>
      %cst_88 = arith.constant 0.000000e+00 : f32
      %201 = vector.broadcast %cst_88 : f32 to vector<2x1x32xf32>
      %cst_89 = arith.constant 0.000000e+00 : f32
      %202 = vector.broadcast %cst_89 : f32 to vector<2x7x32xf32>
      %203 = tpu.concatenate %201, %200, %202 in 1 : vector<2x1x32xf32>, vector<2x16x32xf32>, vector<2x7x32xf32> -> vector<2x24x32xf32>
      %c0_90 = arith.constant 0 : index
      %c0_91 = arith.constant 0 : index
      %c0_92 = arith.constant 0 : index
      %204 = vector.load %arg4[%c0_90, %c0_91, %c0_92] : memref<1x24x32xf32, #tpu.memory_space<vmem>>, vector<1x24x32xf32>
      %205 = vector.broadcast %204 : vector<1x24x32xf32> to vector<2x24x32xf32>
      %206 = arith.addf %203, %205 : vector<2x24x32xf32>
      %c0_93 = arith.constant 0 : index
      %c0_94 = arith.constant 0 : index
      %c0_95 = arith.constant 0 : index
      %207 = vector.load %arg22[%c0_93, %c0_94, %c0_95] : memref<2x24x32xf32, #tpu.memory_space<vmem>>, vector<2x24x32xf32>
      tpu.vector_store %arg22[%c0_93, %c0_94, %c0_95], %206 {strides = array<i32>} : memref<2x24x32xf32, #tpu.memory_space<vmem>>, vector<2x24x32xf32>,
    } else {
    }
    %c0 = arith.constant 0 : index
    %c0_1 = arith.constant 0 : index
    %c0_2 = arith.constant 0 : index
    %3 = vector.load %arg22[%c0, %c0_1, %c0_2] : memref<2x24x32xf32, #tpu.memory_space<vmem>>, vector<2x24x32xf32>
    %4 = vector.shape_cast %3 : vector<2x24x32xf32> to vector<48x32xf32>
    %5 = arith.truncf %4 : vector<48x32xf32> to vector<48x32xbf16>
    %c0_3 = arith.constant 0 : index
    %c0_4 = arith.constant 0 : index
    %c0_5 = arith.constant 0 : index
    %6 = vector.load %arg5[%c0_3, %c0_4, %c0_5] : memref<1x32x96xbf16, #tpu.memory_space<vmem>>, vector<1x32x96xbf16>
    %7 = vector.shape_cast %6 : vector<1x32x96xbf16> to vector<32x96xbf16>
    %cst = arith.constant dense<0.000000e+00> : vector<48x96xf32>
    %8 = tpu.matmul %5, %7, %cst {dimension_numbers = #tpu.dot_dimension_numbers<[1], [0], [0], [1], [0, 0, 1, 1], [], []>} : vector<48x32xbf16>, vector<32x96xbf16>, vector<48x96xf32> -> vector<48x96xf32>
    %c0_6 = arith.constant 0 : index
    %c0_7 = arith.constant 0 : index
    %c0_8 = arith.constant 0 : index
    %9 = vector.load %arg6[%c0_6, %c0_7, %c0_8] : memref<1x1x96xf32, #tpu.memory_space<vmem>>, vector<1x1x96xf32>
    %10 = vector.shape_cast %9 : vector<1x1x96xf32> to vector<1x96xf32>
    %11 = vector.broadcast %10 : vector<1x96xf32> to vector<48x96xf32>
    %12 = arith.addf %8, %11 : vector<48x96xf32>
    %13 = vector.shape_cast %12 : vector<48x96xf32> to vector<2x24x96xf32>
    %14 = arith.truncf %13 : vector<2x24x96xf32> to vector<2x24x96xbf16>
    %15 = tpu.iota {dimensions = array<i32: 2>} : vector<1x1x24xi32>
    %c17_i32 = arith.constant 17 : i32
    %16 = vector.broadcast %c17_i32 : i32 to vector<1x1x24xi32>
    %17 = arith.cmpi slt, %15, %16 : vector<1x1x24xi32>
    %cst_9 = arith.constant 0.000000e+00 : f32
    %cst_10 = arith.constant -1.000000e+30 : f32
    %18 = vector.broadcast %cst_9 : f32 to vector<1x1x24xf32>
    %19 = vector.broadcast %cst_10 : f32 to vector<1x1x24xf32>
    %20 = arith.select %17, %18, %19 : vector<1x1x24xi1>, vector<1x1x24xf32>
    %21 = vector.extract_strided_slice %14 {offsets = [0, 0, 0], sizes = [2, 24, 8], strides = [1, 1, 1]} : vector<2x24x96xbf16> to vector<2x24x8xbf16>
    %22 = vector.extract_strided_slice %14 {offsets = [0, 0, 32], sizes = [2, 24, 8], strides = [1, 1, 1]} : vector<2x24x96xbf16> to vector<2x24x8xbf16>
    %23 = vector.extract_strided_slice %14 {offsets = [0, 0, 64], sizes = [2, 24, 8], strides = [1, 1, 1]} : vector<2x24x96xbf16> to vector<2x24x8xbf16>
    "tpu.trace_start"() <{level = 10 : i32, message = "bqd,bkd->bqk"}> : () -> ()
    %cst_11 = arith.constant dense<0.000000e+00> : vector<2x24x24xf32>
    %24 = tpu.matmul %21, %22, %cst_11 {dimension_numbers = #tpu.dot_dimension_numbers<[2], [2], [1], [1], [0, 0, 0, 1, 1, 1], [0], [0]>} : vector<2x24x8xbf16>, vector<2x24x8xbf16>, vector<2x24x24xf32> -> vector<2x24x24xf32>
    "tpu.trace_stop"() : () -> ()
    %cst_12 = arith.constant 0.353553385 : f32
    %25 = vector.broadcast %cst_12 : f32 to vector<2x24x24xf32>
    %26 = arith.mulf %24, %25 : vector<2x24x24xf32>
    %27 = vector.broadcast %20 : vector<1x1x24xf32> to vector<2x24x24xf32>
    %28 = arith.addf %26, %27 : vector<2x24x24xf32>
    %cst_13 = arith.constant dense<0xFF800000> : vector<2x24xf32>
    %29 = vector.multi_reduction <maximumf>, %28, %cst_13 [2] : vector<2x24x24xf32> to vector<2x24xf32>
    %30 = vector.shape_cast %29 : vector<2x24xf32> to vector<2x24x1xf32>
    %31 = vector.broadcast %30 : vector<2x24x1xf32> to vector<2x24x24xf32>
    %32 = arith.subf %28, %31 : vector<2x24x24xf32>
    %33 = math.exp %32 : vector<2x24x24xf32>
    %cst_14 = arith.constant dense<0.000000e+00> : vector<2x24xf32>
    %34 = vector.multi_reduction <add>, %33, %cst_14 [2] : vector<2x24x24xf32> to vector<2x24xf32>
    %35 = vector.shape_cast %34 : vector<2x24xf32> to vector<2x24x1xf32>
    %36 = tpu.reciprocal %35 {approx = true} : vector<2x24x1xf32> -> vector<2x24x1xf32>
    %37 = vector.broadcast %36 : vector<2x24x1xf32> to vector<2x24x24xf32>
    %38 = arith.mulf %33, %37 : vector<2x24x24xf32>
    %39 = arith.truncf %38 : vector<2x24x24xf32> to vector<2x24x24xbf16>
    "tpu.trace_start"() <{level = 10 : i32, message = "bqk,bkd->bqd"}> : () -> ()
    %cst_15 = arith.constant dense<0.000000e+00> : vector<2x24x8xf32>
    %40 = tpu.matmul %39, %23, %cst_15 {dimension_numbers = #tpu.dot_dimension_numbers<[2], [1], [1], [2], [0, 0, 0, 1, 1, 2], [0], [0]>} : vector<2x24x24xbf16>, vector<2x24x8xbf16>, vector<2x24x8xf32> -> vector<2x24x8xf32>
    "tpu.trace_stop"() : () -> ()
    %41 = vector.extract_strided_slice %14 {offsets = [0, 0, 8], sizes = [2, 24, 8], strides = [1, 1, 1]} : vector<2x24x96xbf16> to vector<2x24x8xbf16>
    %42 = vector.extract_strided_slice %14 {offsets = [0, 0, 40], sizes = [2, 24, 8], strides = [1, 1, 1]} : vector<2x24x96xbf16> to vector<2x24x8xbf16>
    %43 = vector.extract_strided_slice %14 {offsets = [0, 0, 72], sizes = [2, 24, 8], strides = [1, 1, 1]} : vector<2x24x96xbf16> to vector<2x24x8xbf16>
    "tpu.trace_start"() <{level = 10 : i32, message = "bqd,bkd->bqk"}> : () -> ()
    %cst_16 = arith.constant dense<0.000000e+00> : vector<2x24x24xf32>
    %44 = tpu.matmul %41, %42, %cst_16 {dimension_numbers = #tpu.dot_dimension_numbers<[2], [2], [1], [1], [0, 0, 0, 1, 1, 1], [0], [0]>} : vector<2x24x8xbf16>, vector<2x24x8xbf16>, vector<2x24x24xf32> -> vector<2x24x24xf32>
    "tpu.trace_stop"() : () -> ()
    %cst_17 = arith.constant 0.353553385 : f32
    %45 = vector.broadcast %cst_17 : f32 to vector<2x24x24xf32>
    %46 = arith.mulf %44, %45 : vector<2x24x24xf32>
    %47 = vector.broadcast %20 : vector<1x1x24xf32> to vector<2x24x24xf32>
    %48 = arith.addf %46, %47 : vector<2x24x24xf32>
    %cst_18 = arith.constant dense<0xFF800000> : vector<2x24xf32>
    %49 = vector.multi_reduction <maximumf>, %48, %cst_18 [2] : vector<2x24x24xf32> to vector<2x24xf32>
    %50 = vector.shape_cast %49 : vector<2x24xf32> to vector<2x24x1xf32>
    %51 = vector.broadcast %50 : vector<2x24x1xf32> to vector<2x24x24xf32>
    %52 = arith.subf %48, %51 : vector<2x24x24xf32>
    %53 = math.exp %52 : vector<2x24x24xf32>
    %cst_19 = arith.constant dense<0.000000e+00> : vector<2x24xf32>
    %54 = vector.multi_reduction <add>, %53, %cst_19 [2] : vector<2x24x24xf32> to vector<2x24xf32>
    %55 = vector.shape_cast %54 : vector<2x24xf32> to vector<2x24x1xf32>
    %56 = tpu.reciprocal %55 {approx = true} : vector<2x24x1xf32> -> vector<2x24x1xf32>
    %57 = vector.broadcast %56 : vector<2x24x1xf32> to vector<2x24x24xf32>
    %58 = arith.mulf %53, %57 : vector<2x24x24xf32>
    %59 = arith.truncf %58 : vector<2x24x24xf32> to vector<2x24x24xbf16>
    "tpu.trace_start"() <{level = 10 : i32, message = "bqk,bkd->bqd"}> : () -> ()
    %cst_20 = arith.constant dense<0.000000e+00> : vector<2x24x8xf32>
    %60 = tpu.matmul %59, %43, %cst_20 {dimension_numbers = #tpu.dot_dimension_numbers<[2], [1], [1], [2], [0, 0, 0, 1, 1, 2], [0], [0]>} : vector<2x24x24xbf16>, vector<2x24x8xbf16>, vector<2x24x8xf32> -> vector<2x24x8xf32>
    "tpu.trace_stop"() : () -> ()
    %61 = vector.extract_strided_slice %14 {offsets = [0, 0, 16], sizes = [2, 24, 8], strides = [1, 1, 1]} : vector<2x24x96xbf16> to vector<2x24x8xbf16>
    %62 = vector.extract_strided_slice %14 {offsets = [0, 0, 48], sizes = [2, 24, 8], strides = [1, 1, 1]} : vector<2x24x96xbf16> to vector<2x24x8xbf16>
    %63 = vector.extract_strided_slice %14 {offsets = [0, 0, 80], sizes = [2, 24, 8], strides = [1, 1, 1]} : vector<2x24x96xbf16> to vector<2x24x8xbf16>
    "tpu.trace_start"() <{level = 10 : i32, message = "bqd,bkd->bqk"}> : () -> ()
    %cst_21 = arith.constant dense<0.000000e+00> : vector<2x24x24xf32>
    %64 = tpu.matmul %61, %62, %cst_21 {dimension_numbers = #tpu.dot_dimension_numbers<[2], [2], [1], [1], [0, 0, 0, 1, 1, 1], [0], [0]>} : vector<2x24x8xbf16>, vector<2x24x8xbf16>, vector<2x24x24xf32> -> vector<2x24x24xf32>
    "tpu.trace_stop"() : () -> ()
    %cst_22 = arith.constant 0.353553385 : f32
    %65 = vector.broadcast %cst_22 : f32 to vector<2x24x24xf32>
    %66 = arith.mulf %64, %65 : vector<2x24x24xf32>
    %67 = vector.broadcast %20 : vector<1x1x24xf32> to vector<2x24x24xf32>
    %68 = arith.addf %66, %67 : vector<2x24x24xf32>
    %cst_23 = arith.constant dense<0xFF800000> : vector<2x24xf32>
    %69 = vector.multi_reduction <maximumf>, %68, %cst_23 [2] : vector<2x24x24xf32> to vector<2x24xf32>
    %70 = vector.shape_cast %69 : vector<2x24xf32> to vector<2x24x1xf32>
    %71 = vector.broadcast %70 : vector<2x24x1xf32> to vector<2x24x24xf32>
    %72 = arith.subf %68, %71 : vector<2x24x24xf32>
    %73 = math.exp %72 : vector<2x24x24xf32>
    %cst_24 = arith.constant dense<0.000000e+00> : vector<2x24xf32>
    %74 = vector.multi_reduction <add>, %73, %cst_24 [2] : vector<2x24x24xf32> to vector<2x24xf32>
    %75 = vector.shape_cast %74 : vector<2x24xf32> to vector<2x24x1xf32>
    %76 = tpu.reciprocal %75 {approx = true} : vector<2x24x1xf32> -> vector<2x24x1xf32>
    %77 = vector.broadcast %76 : vector<2x24x1xf32> to vector<2x24x24xf32>
    %78 = arith.mulf %73, %77 : vector<2x24x24xf32>
    %79 = arith.truncf %78 : vector<2x24x24xf32> to vector<2x24x24xbf16>
    "tpu.trace_start"() <{level = 10 : i32, message = "bqk,bkd->bqd"}> : () -> ()
    %cst_25 = arith.constant dense<0.000000e+00> : vector<2x24x8xf32>
    %80 = tpu.matmul %79, %63, %cst_25 {dimension_numbers = #tpu.dot_dimension_numbers<[2], [1], [1], [2], [0, 0, 0, 1, 1, 2], [0], [0]>} : vector<2x24x24xbf16>, vector<2x24x8xbf16>, vector<2x24x8xf32> -> vector<2x24x8xf32>
    "tpu.trace_stop"() : () -> ()
    %81 = vector.extract_strided_slice %14 {offsets = [0, 0, 24], sizes = [2, 24, 8], strides = [1, 1, 1]} : vector<2x24x96xbf16> to vector<2x24x8xbf16>
    %82 = vector.extract_strided_slice %14 {offsets = [0, 0, 56], sizes = [2, 24, 8], strides = [1, 1, 1]} : vector<2x24x96xbf16> to vector<2x24x8xbf16>
    %83 = vector.extract_strided_slice %14 {offsets = [0, 0, 88], sizes = [2, 24, 8], strides = [1, 1, 1]} : vector<2x24x96xbf16> to vector<2x24x8xbf16>
    "tpu.trace_start"() <{level = 10 : i32, message = "bqd,bkd->bqk"}> : () -> ()
    %cst_26 = arith.constant dense<0.000000e+00> : vector<2x24x24xf32>
    %84 = tpu.matmul %81, %82, %cst_26 {dimension_numbers = #tpu.dot_dimension_numbers<[2], [2], [1], [1], [0, 0, 0, 1, 1, 1], [0], [0]>} : vector<2x24x8xbf16>, vector<2x24x8xbf16>, vector<2x24x24xf32> -> vector<2x24x24xf32>
    "tpu.trace_stop"() : () -> ()
    %cst_27 = arith.constant 0.353553385 : f32
    %85 = vector.broadcast %cst_27 : f32 to vector<2x24x24xf32>
    %86 = arith.mulf %84, %85 : vector<2x24x24xf32>
    %87 = vector.broadcast %20 : vector<1x1x24xf32> to vector<2x24x24xf32>
    %88 = arith.addf %86, %87 : vector<2x24x24xf32>
    %cst_28 = arith.constant dense<0xFF800000> : vector<2x24xf32>
    %89 = vector.multi_reduction <maximumf>, %88, %cst_28 [2] : vector<2x24x24xf32> to vector<2x24xf32>
    %90 = vector.shape_cast %89 : vector<2x24xf32> to vector<2x24x1xf32>
    %91 = vector.broadcast %90 : vector<2x24x1xf32> to vector<2x24x24xf32>
    %92 = arith.subf %88, %91 : vector<2x24x24xf32>
    %93 = math.exp %92 : vector<2x24x24xf32>
    %cst_29 = arith.constant dense<0.000000e+00> : vector<2x24xf32>
    %94 = vector.multi_reduction <add>, %93, %cst_29 [2] : vector<2x24x24xf32> to vector<2x24xf32>
    %95 = vector.shape_cast %94 : vector<2x24xf32> to vector<2x24x1xf32>
    %96 = tpu.reciprocal %95 {approx = true} : vector<2x24x1xf32> -> vector<2x24x1xf32>
    %97 = vector.broadcast %96 : vector<2x24x1xf32> to vector<2x24x24xf32>
    %98 = arith.mulf %93, %97 : vector<2x24x24xf32>
    %99 = arith.truncf %98 : vector<2x24x24xf32> to vector<2x24x24xbf16>
    "tpu.trace_start"() <{level = 10 : i32, message = "bqk,bkd->bqd"}> : () -> ()
    %cst_30 = arith.constant dense<0.000000e+00> : vector<2x24x8xf32>
    %100 = tpu.matmul %99, %83, %cst_30 {dimension_numbers = #tpu.dot_dimension_numbers<[2], [1], [1], [2], [0, 0, 0, 1, 1, 2], [0], [0]>} : vector<2x24x24xbf16>, vector<2x24x8xbf16>, vector<2x24x8xf32> -> vector<2x24x8xf32>
    "tpu.trace_stop"() : () -> ()
    %101 = tpu.concatenate %40, %60, %80, %100 in 2 : vector<2x24x8xf32>, vector<2x24x8xf32>, vector<2x24x8xf32>, vector<2x24x8xf32> -> vector<2x24x32xf32>
    %102 = vector.shape_cast %101 : vector<2x24x32xf32> to vector<48x32xf32>
    %103 = arith.truncf %102 : vector<48x32xf32> to vector<48x32xbf16>
    %c0_31 = arith.constant 0 : index
    %c0_32 = arith.constant 0 : index
    %c0_33 = arith.constant 0 : index
    %104 = vector.load %arg7[%c0_31, %c0_32, %c0_33] : memref<1x32x32xbf16, #tpu.memory_space<vmem>>, vector<1x32x32xbf16>
    %105 = vector.shape_cast %104 : vector<1x32x32xbf16> to vector<32x32xbf16>
    %cst_34 = arith.constant dense<0.000000e+00> : vector<48x32xf32>
    %106 = tpu.matmul %103, %105, %cst_34 {dimension_numbers = #tpu.dot_dimension_numbers<[1], [0], [0], [1], [0, 0, 1, 1], [], []>} : vector<48x32xbf16>, vector<32x32xbf16>, vector<48x32xf32> -> vector<48x32xf32>
    %c0_35 = arith.constant 0 : index
    %c0_36 = arith.constant 0 : index
    %c0_37 = arith.constant 0 : index
    %107 = vector.load %arg8[%c0_35, %c0_36, %c0_37] : memref<1x1x32xf32, #tpu.memory_space<vmem>>, vector<1x1x32xf32>
    %108 = vector.shape_cast %107 : vector<1x1x32xf32> to vector<1x32xf32>
    %109 = vector.broadcast %108 : vector<1x32xf32> to vector<48x32xf32>
    %110 = arith.addf %106, %109 : vector<48x32xf32>
    %111 = arith.addf %4, %110 : vector<48x32xf32>
    %c0_38 = arith.constant 0 : index
    %c0_39 = arith.constant 0 : index
    %c0_40 = arith.constant 0 : index
    %112 = vector.load %arg9[%c0_38, %c0_39, %c0_40] : memref<1x1x32xf32, #tpu.memory_space<vmem>>, vector<1x1x32xf32>
    %113 = vector.shape_cast %112 : vector<1x1x32xf32> to vector<1x32xf32>
    %c0_41 = arith.constant 0 : index
    %c0_42 = arith.constant 0 : index
    %c0_43 = arith.constant 0 : index
    %114 = vector.load %arg10[%c0_41, %c0_42, %c0_43] : memref<1x1x32xf32, #tpu.memory_space<vmem>>, vector<1x1x32xf32>
    %115 = vector.shape_cast %114 : vector<1x1x32xf32> to vector<1x32xf32>
    %cst_44 = arith.constant dense<0.000000e+00> : vector<48xf32>
    %116 = vector.multi_reduction <add>, %111, %cst_44 [1] : vector<48x32xf32> to vector<48xf32>
    %117 = vector.shape_cast %116 : vector<48xf32> to vector<48x1xf32>
    %cst_45 = arith.constant 3.200000e+01 : f32
    %118 = vector.broadcast %cst_45 : f32 to vector<48x1xf32>
    %119 = arith.divf %117, %118 : vector<48x1xf32>
    %120 = vector.broadcast %119 : vector<48x1xf32> to vector<48x32xf32>
    %121 = arith.subf %111, %120 : vector<48x32xf32>
    %122 = arith.mulf %121, %121 : vector<48x32xf32>
    %cst_46 = arith.constant dense<0.000000e+00> : vector<48xf32>
    %123 = vector.multi_reduction <add>, %122, %cst_46 [1] : vector<48x32xf32> to vector<48xf32>
    %124 = vector.shape_cast %123 : vector<48xf32> to vector<48x1xf32>
    %cst_47 = arith.constant 3.200000e+01 : f32
    %125 = vector.broadcast %cst_47 : f32 to vector<48x1xf32>
    %126 = arith.divf %124, %125 : vector<48x1xf32>
    %127 = vector.broadcast %119 : vector<48x1xf32> to vector<48x32xf32>
    %128 = arith.subf %111, %127 : vector<48x32xf32>
    %cst_48 = arith.constant 9.99999974E-6 : f32
    %129 = vector.broadcast %cst_48 : f32 to vector<48x1xf32>
    %130 = arith.addf %126, %129 : vector<48x1xf32>
    %131 = math.rsqrt %130 : vector<48x1xf32>
    %132 = vector.broadcast %131 : vector<48x1xf32> to vector<48x32xf32>
    %133 = arith.mulf %128, %132 : vector<48x32xf32>
    %134 = vector.broadcast %113 : vector<1x32xf32> to vector<48x32xf32>
    %135 = arith.mulf %133, %134 : vector<48x32xf32>
    %136 = vector.broadcast %115 : vector<1x32xf32> to vector<48x32xf32>
    %137 = arith.addf %135, %136 : vector<48x32xf32>
    %138 = arith.truncf %137 : vector<48x32xf32> to vector<48x32xbf16>
    %c0_49 = arith.constant 0 : index
    %c0_50 = arith.constant 0 : index
    %c0_51 = arith.constant 0 : index
    %139 = vector.load %arg11[%c0_49, %c0_50, %c0_51] : memref<1x32x64xbf16, #tpu.memory_space<vmem>>, vector<1x32x64xbf16>
    %140 = vector.shape_cast %139 : vector<1x32x64xbf16> to vector<32x64xbf16>
    %cst_52 = arith.constant dense<0.000000e+00> : vector<48x64xf32>
    %141 = tpu.matmul %138, %140, %cst_52 {dimension_numbers = #tpu.dot_dimension_numbers<[1], [0], [0], [1], [0, 0, 1, 1], [], []>} : vector<48x32xbf16>, vector<32x64xbf16>, vector<48x64xf32> -> vector<48x64xf32>
    %c0_53 = arith.constant 0 : index
    %c0_54 = arith.constant 0 : index
    %c0_55 = arith.constant 0 : index
    %142 = vector.load %arg12[%c0_53, %c0_54, %c0_55] : memref<1x1x64xf32, #tpu.memory_space<vmem>>, vector<1x1x64xf32>
    %143 = vector.shape_cast %142 : vector<1x1x64xf32> to vector<1x64xf32>
    %144 = vector.broadcast %143 : vector<1x64xf32> to vector<48x64xf32>
    %145 = arith.addf %141, %144 : vector<48x64xf32>
    %cst_56 = arith.constant 5.000000e-01 : f32
    %146 = vector.broadcast %cst_56 : f32 to vector<48x64xf32>
    %147 = arith.mulf %146, %145 : vector<48x64xf32>
    %cst_57 = arith.constant 1.41421354 : f32
    %148 = vector.broadcast %cst_57 : f32 to vector<48x64xf32>
    %149 = arith.divf %145, %148 : vector<48x64xf32>
    %150 = math.erf %149 : vector<48x64xf32>
    %cst_58 = arith.constant 1.000000e+00 : f32
    %151 = vector.broadcast %cst_58 : f32 to vector<48x64xf32>
    %152 = arith.addf %151, %150 : vector<48x64xf32>
    %153 = arith.mulf %147, %152 : vector<48x64xf32>
    %154 = arith.truncf %153 : vector<48x64xf32> to vector<48x64xbf16>
    %c0_59 = arith.constant 0 : index
    %c0_60 = arith.constant 0 : index
    %c0_61 = arith.constant 0 : index
    %155 = vector.load %arg13[%c0_59, %c0_60, %c0_61] : memref<1x64x32xbf16, #tpu.memory_space<vmem>>, vector<1x64x32xbf16>
    %156 = vector.shape_cast %155 : vector<1x64x32xbf16> to vector<64x32xbf16>
    %cst_62 = arith.constant dense<0.000000e+00> : vector<48x32xf32>
    %157 = tpu.matmul %154, %156, %cst_62 {dimension_numbers = #tpu.dot_dimension_numbers<[1], [0], [0], [1], [0, 0, 1, 1], [], []>} : vector<48x64xbf16>, vector<64x32xbf16>, vector<48x32xf32> -> vector<48x32xf32>
    %c0_63 = arith.constant 0 : index
    %c0_64 = arith.constant 0 : index
    %c0_65 = arith.constant 0 : index
    %158 = vector.load %arg14[%c0_63, %c0_64, %c0_65] : memref<1x1x32xf32, #tpu.memory_space<vmem>>, vector<1x1x32xf32>
    %159 = vector.shape_cast %158 : vector<1x1x32xf32> to vector<1x32xf32>
    %160 = vector.broadcast %159 : vector<1x32xf32> to vector<48x32xf32>
    %161 = arith.addf %157, %160 : vector<48x32xf32>
    %162 = arith.addf %137, %161 : vector<48x32xf32>
    %c0_66 = arith.constant 0 : index
    %c0_67 = arith.constant 0 : index
    %c0_68 = arith.constant 0 : index
    %163 = vector.load %arg15[%c0_66, %c0_67, %c0_68] : memref<1x1x32xf32, #tpu.memory_space<vmem>>, vector<1x1x32xf32>
    %164 = vector.shape_cast %163 : vector<1x1x32xf32> to vector<1x32xf32>
    %c0_69 = arith.constant 0 : index
    %c0_70 = arith.constant 0 : index
    %c0_71 = arith.constant 0 : index
    %165 = vector.load %arg16[%c0_69, %c0_70, %c0_71] : memref<1x1x32xf32, #tpu.memory_space<vmem>>, vector<1x1x32xf32>
    %166 = vector.shape_cast %165 : vector<1x1x32xf32> to vector<1x32xf32>
    %cst_72 = arith.constant dense<0.000000e+00> : vector<48xf32>
    %167 = vector.multi_reduction <add>, %162, %cst_72 [1] : vector<48x32xf32> to vector<48xf32>
    %168 = vector.shape_cast %167 : vector<48xf32> to vector<48x1xf32>
    %cst_73 = arith.constant 3.200000e+01 : f32
    %169 = vector.broadcast %cst_73 : f32 to vector<48x1xf32>
    %170 = arith.divf %168, %169 : vector<48x1xf32>
    %171 = vector.broadcast %170 : vector<48x1xf32> to vector<48x32xf32>
    %172 = arith.subf %162, %171 : vector<48x32xf32>
    %173 = arith.mulf %172, %172 : vector<48x32xf32>
    %cst_74 = arith.constant dense<0.000000e+00> : vector<48xf32>
    %174 = vector.multi_reduction <add>, %173, %cst_74 [1] : vector<48x32xf32> to vector<48xf32>
    %175 = vector.shape_cast %174 : vector<48xf32> to vector<48x1xf32>
    %cst_75 = arith.constant 3.200000e+01 : f32
    %176 = vector.broadcast %cst_75 : f32 to vector<48x1xf32>
    %177 = arith.divf %175, %176 : vector<48x1xf32>
    %178 = vector.broadcast %170 : vector<48x1xf32> to vector<48x32xf32>
    %179 = arith.subf %162, %178 : vector<48x32xf32>
    %cst_76 = arith.constant 9.99999974E-6 : f32
    %180 = vector.broadcast %cst_76 : f32 to vector<48x1xf32>
    %181 = arith.addf %177, %180 : vector<48x1xf32>
    %182 = math.rsqrt %181 : vector<48x1xf32>
    %183 = vector.broadcast %182 : vector<48x1xf32> to vector<48x32xf32>
    %184 = arith.mulf %179, %183 : vector<48x32xf32>
    %185 = vector.broadcast %164 : vector<1x32xf32> to vector<48x32xf32>
    %186 = arith.mulf %184, %185 : vector<48x32xf32>
    %187 = vector.broadcast %166 : vector<1x32xf32> to vector<48x32xf32>
    %188 = arith.addf %186, %187 : vector<48x32xf32>
    %189 = vector.shape_cast %188 : vector<48x32xf32> to vector<2x24x32xf32>
    %c0_77 = arith.constant 0 : index
    %c0_78 = arith.constant 0 : index
    %c0_79 = arith.constant 0 : index
    %190 = vector.load %arg22[%c0_77, %c0_78, %c0_79] : memref<2x24x32xf32, #tpu.memory_space<vmem>>, vector<2x24x32xf32>
    tpu.vector_store %arg22[%c0_77, %c0_78, %c0_79], %189 {strides = array<i32>} : memref<2x24x32xf32, #tpu.memory_space<vmem>>, vector<2x24x32xf32>,
    %c1_i32 = arith.constant 1 : i32
    %191 = arith.cmpi eq, %arg0, %c1_i32 : i32
    %192 = arith.extui %191 : i1 to i32
    %c0_i32_80 = arith.constant 0 : i32
    %193 = arith.cmpi ne, %192, %c0_i32_80 : i32
    scf.if %193 {
      %c0_81 = arith.constant 0 : index
      %c0_82 = arith.constant 0 : index
      %c0_83 = arith.constant 0 : index
      %194 = vector.load %arg22[%c0_81, %c0_82, %c0_83] : memref<2x24x32xf32, #tpu.memory_space<vmem>>, vector<2x1x32xf32>
      %195 = vector.shape_cast %194 : vector<2x1x32xf32> to vector<2x32xf32>
      %c0_84 = arith.constant 0 : index
      %c0_85 = arith.constant 0 : index
      %196 = vector.load %arg17[%c0_84, %c0_85] : memref<1x32xf32, #tpu.memory_space<vmem>>, vector<1x32xf32>
      %c0_86 = arith.constant 0 : index
      %c0_87 = arith.constant 0 : index
      %197 = vector.load %arg18[%c0_86, %c0_87] : memref<1x32xf32, #tpu.memory_space<vmem>>, vector<1x32xf32>
      %cst_88 = arith.constant dense<0.000000e+00> : vector<2xf32>
      %198 = vector.multi_reduction <add>, %195, %cst_88 [1] : vector<2x32xf32> to vector<2xf32>
      %199 = vector.shape_cast %198 : vector<2xf32> to vector<2x1xf32>
      %cst_89 = arith.constant 3.200000e+01 : f32
      %200 = vector.broadcast %cst_89 : f32 to vector<2x1xf32>
      %201 = arith.divf %199, %200 : vector<2x1xf32>
      %202 = vector.broadcast %201 : vector<2x1xf32> to vector<2x32xf32>
      %203 = arith.subf %195, %202 : vector<2x32xf32>
      %204 = arith.mulf %203, %203 : vector<2x32xf32>
      %cst_90 = arith.constant dense<0.000000e+00> : vector<2xf32>
      %205 = vector.multi_reduction <add>, %204, %cst_90 [1] : vector<2x32xf32> to vector<2xf32>
      %206 = vector.shape_cast %205 : vector<2xf32> to vector<2x1xf32>
      %cst_91 = arith.constant 3.200000e+01 : f32
      %207 = vector.broadcast %cst_91 : f32 to vector<2x1xf32>
      %208 = arith.divf %206, %207 : vector<2x1xf32>
      %209 = vector.broadcast %201 : vector<2x1xf32> to vector<2x32xf32>
      %210 = arith.subf %195, %209 : vector<2x32xf32>
      %cst_92 = arith.constant 9.99999974E-6 : f32
      %211 = vector.broadcast %cst_92 : f32 to vector<2x1xf32>
      %212 = arith.addf %208, %211 : vector<2x1xf32>
      %213 = math.rsqrt %212 : vector<2x1xf32>
      %214 = vector.broadcast %213 : vector<2x1xf32> to vector<2x32xf32>
      %215 = arith.mulf %210, %214 : vector<2x32xf32>
      %216 = vector.broadcast %196 : vector<1x32xf32> to vector<2x32xf32>
      %217 = arith.mulf %215, %216 : vector<2x32xf32>
      %218 = vector.broadcast %197 : vector<1x32xf32> to vector<2x32xf32>
      %219 = arith.addf %217, %218 : vector<2x32xf32>
      %220 = arith.truncf %219 : vector<2x32xf32> to vector<2x32xbf16>
      %c0_93 = arith.constant 0 : index
      %c0_94 = arith.constant 0 : index
      %221 = vector.load %arg19[%c0_93, %c0_94] : memref<32x10xbf16, #tpu.memory_space<vmem>>, vector<32x10xbf16>
      %cst_95 = arith.constant dense<0.000000e+00> : vector<2x10xf32>
      %222 = tpu.matmul %220, %221, %cst_95 {dimension_numbers = #tpu.dot_dimension_numbers<[1], [0], [0], [1], [0, 0, 1, 1], [], []>} : vector<2x32xbf16>, vector<32x10xbf16>, vector<2x10xf32> -> vector<2x10xf32>
      %c0_96 = arith.constant 0 : index
      %c0_97 = arith.constant 0 : index
      %223 = vector.load %arg20[%c0_96, %c0_97] : memref<1x10xf32, #tpu.memory_space<vmem>>, vector<1x10xf32>
      %224 = vector.broadcast %223 : vector<1x10xf32> to vector<2x10xf32>
      %225 = arith.addf %222, %224 : vector<2x10xf32>
      %c0_98 = arith.constant 0 : index
      %c0_99 = arith.constant 0 : index
      %226 = vector.load %arg21[%c0_98, %c0_99] : memref<2x10xf32, #tpu.memory_space<vmem>>, vector<2x10xf32>
      tpu.vector_store %arg21[%c0_98, %c0_99], %225 {strides = array<i32>} : memref<2x10xf32, #tpu.memory_space<vmem>>, vector<2x10xf32>,
    } else {
    }
    return
  }
  func.func @transform_0(%arg0: i32) -> (i32, i32) {
    %c0_i32 = arith.constant 0 : i32
    %c0_i32_0 = arith.constant 0 : i32
    %c0_i32_1 = arith.constant 0 : i32
    return %c0_i32, %c0_i32_0 : i32, i32
  }
  func.func @transform_1(%arg0: i32) -> (i32, i32) {
    %c0_i32 = arith.constant 0 : i32
    %c0_i32_0 = arith.constant 0 : i32
    %c0_i32_1 = arith.constant 0 : i32
    return %c0_i32, %c0_i32_0 : i32, i32
  }
  func.func @transform_2(%arg0: i32) -> (i32, i32) {
    %c0_i32 = arith.constant 0 : i32
    %c0_i32_0 = arith.constant 0 : i32
    %c0_i32_1 = arith.constant 0 : i32
    return %c0_i32, %c0_i32_0 : i32, i32
  }
  func.func @transform_3(%arg0: i32) -> (i32, i32, i32) {
    %c0_i32 = arith.constant 0 : i32
    %c0_i32_0 = arith.constant 0 : i32
    %c0_i32_1 = arith.constant 0 : i32
    %c0_i32_2 = arith.constant 0 : i32
    return %c0_i32, %c0_i32_0, %c0_i32_1 : i32, i32, i32
  }
  func.func @transform_4(%arg0: i32) -> (i32, i32, i32) {
    %c0_i32 = arith.constant 0 : i32
    %c0_i32_0 = arith.constant 0 : i32
    %c0_i32_1 = arith.constant 0 : i32
    return %arg0, %c0_i32, %c0_i32_0 : i32, i32, i32
  }
  func.func @transform_5(%arg0: i32) -> (i32, i32, i32) {
    %c0_i32 = arith.constant 0 : i32
    %c0_i32_0 = arith.constant 0 : i32
    %c0_i32_1 = arith.constant 0 : i32
    return %arg0, %c0_i32, %c0_i32_0 : i32, i32, i32
  }
  func.func @transform_6(%arg0: i32) -> (i32, i32, i32) {
    %c0_i32 = arith.constant 0 : i32
    %c0_i32_0 = arith.constant 0 : i32
    %c0_i32_1 = arith.constant 0 : i32
    return %arg0, %c0_i32, %c0_i32_0 : i32, i32, i32
  }
  func.func @transform_7(%arg0: i32) -> (i32, i32, i32) {
    %c0_i32 = arith.constant 0 : i32
    %c0_i32_0 = arith.constant 0 : i32
    %c0_i32_1 = arith.constant 0 : i32
    return %arg0, %c0_i32, %c0_i32_0 : i32, i32, i32
  }
  func.func @transform_8(%arg0: i32) -> (i32, i32, i32) {
    %c0_i32 = arith.constant 0 : i32
    %c0_i32_0 = arith.constant 0 : i32
    %c0_i32_1 = arith.constant 0 : i32
    return %arg0, %c0_i32, %c0_i32_0 : i32, i32, i32
  }
  func.func @transform_9(%arg0: i32) -> (i32, i32, i32) {
    %c0_i32 = arith.constant 0 : i32
    %c0_i32_0 = arith.constant 0 : i32
    %c0_i32_1 = arith.constant 0 : i32
    return %arg0, %c0_i32, %c0_i32_0 : i32, i32, i32
  }
  func.func @transform_10(%arg0: i32) -> (i32, i32, i32) {
    %c0_i32 = arith.constant 0 : i32
    %c0_i32_0 = arith.constant 0 : i32
    %c0_i32_1 = arith.constant 0 : i32
    return %arg0, %c0_i32, %c0_i32_0 : i32, i32, i32
  }
  func.func @transform_11(%arg0: i32) -> (i32, i32, i32) {
    %c0_i32 = arith.constant 0 : i32
    %c0_i32_0 = arith.constant 0 : i32
    %c0_i32_1 = arith.constant 0 : i32
    return %arg0, %c0_i32, %c0_i32_0 : i32, i32, i32
  }
  func.func @transform_12(%arg0: i32) -> (i32, i32, i32) {
    %c0_i32 = arith.constant 0 : i32
    %c0_i32_0 = arith.constant 0 : i32
    %c0_i32_1 = arith.constant 0 : i32
    return %arg0, %c0_i32, %c0_i32_0 : i32, i32, i32
  }
  func.func @transform_13(%arg0: i32) -> (i32, i32, i32) {
    %c0_i32 = arith.constant 0 : i32
    %c0_i32_0 = arith.constant 0 : i32
    %c0_i32_1 = arith.constant 0 : i32
    return %arg0, %c0_i32, %c0_i32_0 : i32, i32, i32
  }
  func.func @transform_14(%arg0: i32) -> (i32, i32, i32) {
    %c0_i32 = arith.constant 0 : i32
    %c0_i32_0 = arith.constant 0 : i32
    %c0_i32_1 = arith.constant 0 : i32
    return %arg0, %c0_i32, %c0_i32_0 : i32, i32, i32
  }
  func.func @transform_15(%arg0: i32) -> (i32, i32, i32) {
    %c0_i32 = arith.constant 0 : i32
    %c0_i32_0 = arith.constant 0 : i32
    %c0_i32_1 = arith.constant 0 : i32
    return %arg0, %c0_i32, %c0_i32_0 : i32, i32, i32
  }
  func.func @transform_16(%arg0: i32) -> (i32, i32) {
    %c0_i32 = arith.constant 0 : i32
    %c0_i32_0 = arith.constant 0 : i32
    %c0_i32_1 = arith.constant 0 : i32
    return %c0_i32, %c0_i32_0 : i32, i32
  }
  func.func @transform_17(%arg0: i32) -> (i32, i32) {
    %c0_i32 = arith.constant 0 : i32
    %c0_i32_0 = arith.constant 0 : i32
    %c0_i32_1 = arith.constant 0 : i32
    return %c0_i32, %c0_i32_0 : i32, i32
  }
  func.func @transform_18(%arg0: i32) -> (i32, i32) {
    %c0_i32 = arith.constant 0 : i32
    %c0_i32_0 = arith.constant 0 : i32
    %c0_i32_1 = arith.constant 0 : i32
    return %c0_i32, %c0_i32_0 : i32, i32
  }
  func.func @transform_19(%arg0: i32) -> (i32, i32) {
    %c0_i32 = arith.constant 0 : i32
    %c0_i32_0 = arith.constant 0 : i32
    %c0_i32_1 = arith.constant 0 : i32
    return %c0_i32, %c0_i32_0 : i32, i32
  }
  func.func @transform_20(%arg0: i32) -> (i32, i32) {
    %c0_i32 = arith.constant 0 : i32
    %c0_i32_0 = arith.constant 0 : i32
    %c0_i32_1 = arith.constant 0 : i32
    return %c0_i32, %c0_i32_0 : i32, i32
  }
}

</mosaic_0001>

<bundles_post_ra>
// kernel: tiny_vit_forward.1
= control target key start
LH: loop header
LB: loop body
LE: loop exit
PB: predicated region body
PF: predicated region fallthrough
CT: control target
= control target key end

     0   :  { %s4844_s0 = inlined_call_operand.vmem [shape: bf16[32,64], index: 0, kind: input, shape index: {}]   ;;  %s4845_s1 = inlined_call_operand.vmem [shape: bf16[64,32], index: 1, kind: input, shape index: {}]   ;;  %s4846_s2 = inlined_call_operand.vmem [shape: f32[1,32], index: 2, kind: input, shape index: {}]   ;;  %s4847_s3 = inlined_call_operand.vmem [shape: f32[1,24,32], index: 3, kind: input, shape index: {}]   ;;  %s4848_s4 = inlined_call_operand.vmem [shape: bf16[2,32,96], index: 4, kind: input, shape index: {}]   ;;  %s4849_s5 = inlined_call_operand.vmem [shape: f32[2,1,96], index: 5, kind: input, shape index: {}]   ;;  %s4850_s6 = inlined_call_operand.vmem [shape: bf16[2,32,32], index: 6, kind: input, shape index: {}]   ;;  %s4851_s7 = inlined_call_operand.vmem [shape: f32[2,1,32], index: 7, kind: input, shape index: {}]   ;;  %s4852_s8 = inlined_call_operand.vmem [shape: f32[2,1,32], index: 8, kind: input, shape index: {}]   ;;  %s4853_s9 = inlined_call_operand.vmem [shape: f32[2,1,32], index: 9, kind: input, shape index: {}]   ;;  %s4854_s10 = inlined_call_operand.vmem [shape: bf16[2,32,64], index: 10, kind: input, shape index: {}]   ;;  %s4855_s11 = inlined_call_operand.vmem [shape: f32[2,1,64], index: 11, kind: input, shape index: {}]   ;;  %s4856_s12 = inlined_call_operand.vmem [shape: bf16[2,64,32], index: 12, kind: input, shape index: {}]   ;;  %s4857_s13 = inlined_call_operand.vmem [shape: f32[2,1,32], index: 13, kind: input, shape index: {}]   ;;  %s4858_s14 = inlined_call_operand.vmem [shape: f32[2,1,32], index: 14, kind: input, shape index: {}]   ;;  %s4859_s15 = inlined_call_operand.vmem [shape: f32[2,1,32], index: 15, kind: input, shape index: {}]   ;;  %s4860_s16 = inlined_call_operand.vmem [shape: f32[1,32], index: 16, kind: input, shape index: {}]   ;;  %s4861_s17 = inlined_call_operand.vmem [shape: f32[1,32], index: 17, kind: input, shape index: {}]   ;;  %s4862_s18 = inlined_call_operand.vmem [shape: bf16[32,10], index: 18, kind: input, shape index: {}]   ;;  %s4863_s19 = inlined_call_operand.vmem [shape: f32[1,10], index: 19, kind: input, shape index: {}]   ;;  %s4864_s20 = inlined_call_operand.hbm [shape: f32[2,10], index: 20, kind: output, shape index: {}]  }
   0x1   :  { %4870 = sst [smem:[#allocation7_spill]] %s4844_s0 }
   0x2   :  { %4871 = sst [smem:[#allocation8_spill]] %s4845_s1 }
   0x3   :  { %4872 = sst [smem:[#allocation9_spill]] %s4846_s2 }
   0x4   :  { %4873 = sst [smem:[#allocation10_spill]] %s4847_s3 }
   0x5   :  { %4874 = sst [smem:[#allocation11_spill]] %s4848_s4 }
   0x6   :  { %4875 = sst [smem:[#allocation12_spill]] %s4850_s6 }
   0x7   :  { %4876 = sst [smem:[#allocation13_spill]] %s4860_s16 }
   0x8   :  { %4877 = sst [smem:[#allocation14_spill]] %s4861_s17 }
   0x9   :  { %4878 = sst [smem:[#allocation15_spill]] %s4862_s18 }
   0xa   :  { %4879 = sst [smem:[#allocation16_spill]] %s4863_s19 }
   0xb   :  { %4880 = sst [smem:[#allocation17_spill]] %s4864_s20 }
   0xc   :  { %25 = vsyncpa [#allocation4], 0  ;;  %s4178_s1 = smov 0  }
   0xd LB: > { %4881 = sst [smem:[#allocation6_spill]] %s4051_s1  ;;  %s4184_s22 = sadd.s32 4294967295, %s4051_s1   ;;  %s4051_s1 = sphi %s4178_s1, %s31_s1  }
   0xe   : > { %p3349_p0 = scmp.ge.s32.totalorder %s4051_s1, 1  ;;  %p652_p1 = scmp.lt.s32.totalorder %s4051_s1, 3 }
  0x10   : > { %p653_p2 = pnand %p3349_p0, %p652_p1 }
  0x11   : > { %p744_p3 = scmp.lt.s32.totalorder (!%p653_p2), %s4184_s22, 1  ;;  %s4882_s28 = sld [smem:[#allocation11_spill]] (!%p653_p2) }
  0x12   : > { %656 = sbr.rel (%p653_p2) target bundleno = 4992 (0x1380), region = 100  ;;  %s4883_s6 = sld [smem:[#allocation12_spill]] (!%p653_p2) }
  0x13   : > { %p3358_p4 = scmp.ne.s32.totalorder (!%p653_p2), %s4184_s22, 0 }
  0x17   : > { %s4190_s23 = scalar_select %p744_p3, %s4184_s22, 1 }
  0x18   : > { %s4884_s1 = sld [smem:[#allocation8_spill]] (!%p3358_p4) }
  0x19   : > { %s3441_s24 = sshll.u32 %s4190_s23, 4  ;;  %s3444_s18 = sshll.u32 %s4190_s23, 5 }
  0x1a   : > { %s4200_s4 = scalar_lea.vmem %s4882_s28, %s3441_s24  ;;  %s4205_s0 = scalar_lea.vmem %s4883_s6, %s3441_s24 }
  0x1b   : > { %s4222_s28 = scalar_lea.vmem %s4854_s10, %s3441_s24  ;;  %s4232_s20 = scalar_lea.vmem %s4856_s12, %s3444_s18 }
  0x1c   : > { %s781_s2 = scalar_lea.vmem %s4857_s13, %s4190_s23  ;;  %s784_s26 = scalar_lea.vmem %s4858_s14, %s4190_s23 }
  0x1d   : > { %s787_s16 = scalar_lea.vmem %s4859_s15, %s4190_s23  ;;  %792 = sbr.rel (%p3358_p4) target bundleno = 258 (0x102), region = 104 }
  0x1e   : > { %s4885_s21 = smov (!%p3358_p4), %s4884_s1  ;;  %s4886_s24 = sld [smem:[#allocation7_spill]] (!%p3358_p4) }
  0x1f   : > { %s4887_s17 = sld [smem:[#allocation9_spill]] (!%p3358_p4) }
  0x20   : > { %s4888_s25 = sld [smem:[#allocation10_spill]] (!%p3358_p4) }
  0x22   : > { %v3814_v0 = vld [vmem:[%s4884_s1 + $0x18] sm:$0xff]   ;;  %v3815_v1 = vld [vmem:[%s4885_s21 + $0x10] sm:$0xff]   ;;  %v3816_v2 = vld [vmem:[%s4885_s21 + $0x8] sm:$0xff]   ;;  %vm846_vm0 = vcmask 523264   ;;  %vm906_vm1 = vcmask 1040384   ;;  %vm932_vm2 = vcmask 261120  }
  0x23   : > { %3540 = vmatprep.subr.bf16.mxu0 %v3814_v0  ;;  %v3817_v4 = vld [vmem:[%s4885_s21] sm:$0xff]  }
  0x24   : > { %3541 = vmatpush3.bf16.msra.mxu0 %v3814_v0  ;;  %v3818_v3 = vld [vmem:[%s4886_s24] sm:$0xff]   ;;  %v3819_v5 = vld [vmem:[%s4886_s24 + $0x8] sm:$0xff]  }
  0x25   : > { %3542 = vmatprep.subr.bf16.mxu0 %v3815_v1  ;;  %3548 = vmatprep.mubr.msk.bf16.mxu0 %vm846_vm0, %v3818_v3  ;;  %v3359_v6 = vld [vmem:[%s4887_s17] ss:$0 sm:$0xff] }
  0x26   : > { %v923_v11 = vld [vmem:[%s4888_s25] sm:$0xff]  ;;  %v924_v21 = vld [vmem:[%s4888_s25 + $0x8] sm:$0xff]  ;;  %v925_v22 = vld [vmem:[%s4888_s25 + $0x10] sm:$0xff] }
  0x28   : > { %3543 = vmatpush3.bf16.msra.mxu0 %v3815_v1 }
  0x29   : > { %3544 = vmatprep.subr.bf16.mxu0 %v3816_v2 }
  0x2c   : > { %3545 = vmatpush3.bf16.msra.mxu0 %v3816_v2 }
  0x2d   : > { %3546 = vmatprep.subr.bf16.mxu0 %v3817_v4 }
  0x30   : > { %3547 = vmatpush3.bf16.msra.mxu0 %v3817_v4 }
  0x33   : > { %3549 = vmatmul.mubr.msk.bf16.vlgmr.msra.gmra.mxu0 %vm846_vm0, %v3819_v5 }
  0xf3   : > { %v3550_v7 = vpop.f32.mrf.mxu0 }
  0xf4   : > { %v896_v8 = vadd.f32 %v3550_v7, %v3359_v6 }
  0xf5   : > { %v887_v9 = vpop.f32.mrf.mxu0 }
  0xf6   : > { %v910_v10 = vrot.slane %v896_v8, 7  ;;  %v888_v12 = vadd.f32 %v3359_v6, %v887_v9 }
  0xf7   : > { %v3551_v13 = vpop.f32.mrf.mxu0 }
  0xf8   : > { %v920_v14 = vsel %vm906_vm1, 0.0, %v910_v10  ;;  %v907_v15 = vrot.slane %v888_v12, 7  ;;  %v899_v16 = vadd.f32 %v3551_v13, %v3359_v6 }
  0xf9   : > { %v929_v17 = vadd.f32 %v923_v11, %v920_v14  ;;  %v890_v18 = vpop.f32.mrf.mxu0 }
  0xfa   : > { %v919_v19 = vsel %vm906_vm1, 0.0, %v907_v15  ;;  %v911_v20 = vrot.slane %v899_v16, 7  ;;  %v891_v23 = vadd.f32 %v3359_v6, %v890_v18 }
  0xfb   : > { %936 = vst.msk [vmem:[#allocation2 + $0x18] sm:$0xff] %vm932_vm2, %v929_v17  ;;  %v926_v24 = vadd.f32 %v923_v11, %v919_v19 }
  0xfc   : > { %v912_v25 = vsel %vm906_vm1, %v910_v10, %v911_v20  ;;  %v922_v26 = vsel %vm906_vm1, %v911_v20, 0.0  ;;  %v908_v27 = vrot.slane %v891_v23, 7 }
  0xfd   : > { %933 = vst.msk [vmem:[#allocation2] sm:$0xff] %vm932_vm2, %v926_v24  ;;  %v930_v28 = vadd.f32 %v924_v21, %v912_v25  ;;  %v931_v29 = vadd.f32 %v925_v22, %v922_v26 }
  0xfe   : > { %v909_v30 = vsel %vm906_vm1, %v907_v15, %v908_v27  ;;  %v921_v31 = vsel %vm906_vm1, %v908_v27, 0.0 }
  0xff   : > { %937 = vst.msk [vmem:[#allocation2 + $0x20] sm:$0xff] %vm932_vm2, %v930_v28  ;;  %938 = vst.msk [vmem:[#allocation2 + $0x28] sm:$0xff] %vm932_vm2, %v931_v29  ;;  %v927_v32 = vadd.f32 %v924_v21, %v909_v30  ;;  %v928_v33 = vadd.f32 %v925_v22, %v921_v31 }
 0x101   : > { %934 = vst.msk [vmem:[#allocation2 + $0x8] sm:$0xff] %vm932_vm2, %v927_v32  ;;  %935 = vst.msk [vmem:[#allocation2 + $0x10] sm:$0xff] %vm932_vm2, %v928_v33 }
 0x102 PF: > { %v3865_v34 = vld [vmem:[%s4200_s4 + $0x8] sm:$0xff]   ;;  %v4053_v35 = vmov 0.0   ;;  %v3866_v36 = vld [vmem:[%s4200_s4] sm:$0xff]   ;;  %vm4054_vm3 = vmmov 0   ;;  %vm971_vm4 = vcmask 261120   ;;  %v942_v41 = vld [vmem:[#allocation2 + $0x18] sm:$0xff]  ;;  %s4889_s18 = scalar_lea.vmem %s4849_s5, %s4190_s23  ;;  %v1042_v13 = vlaneseq }
 0x103   : > { %3552 = vmatprep.subr.bf16.mxu1 %v4053_v35  ;;  %3556 = vmatprep.mubr.msk.bf16.mxu1 %vm4054_vm3, %v4053_v35  ;;  %v3368_v47 = vld [vmem:[%s4889_s18] ss:$0 sm:$0xff]  ;;  %vm1052_vm5 = vcmask 64512   ;;  %s4055_s17 = smov 96   ;;  %v4056_v20 = vmov -1e+30  }
 0x104   : > { %3553 = vmatpush3.bf16.msra.mxu1 %v3865_v34  ;;  %v939_v37 = vld [vmem:[#allocation2] sm:$0xff]  ;;  %v1043_v14 = vand.u32 127, %v1042_v13  ;;  %vm1191_vm7 = vcmask 195584   ;;  %s4057_s3 = smov 64   ;;  %s4058_s19 = smov 88   ;;  %vm1273_vm8 = vcmask 1043456  }
 0x105   : > { %3554 = vmatprep.subr.bf16.mxu1 %v4053_v35  ;;  %s4059_s27 = smov 120   ;;  %s4060_s29 = smov 56   ;;  %vm2491_vm9 = vcmask 130048   ;;  %vm2872_vm10 = vcmask 523264  }
 0x106   : > { %v943_v43 = vld [vmem:[#allocation2 + $0x20] sm:$0xff]  ;;  %v944_v44 = vld [vmem:[#allocation2 + $0x28] sm:$0xff]  ;;  %vm1044_vm6 = vcmp.lt.s32.totalorder %v1043_v14, 17  ;;  %s4061_s6 = smov 80   ;;  %s4062_s30 = smov 112  }
 0x107   : > { %v947_v45 = vpack.c.bf16 %v944_v44, %v943_v43  ;;  %v4335_v21 = vsel %vm1044_vm6, 0.0, %v4056_v20  ;;  %s4063_s4 = smov 48   ;;  %s4064_s1 = smov 72  }
 0x108   : > { %v940_v38 = vld [vmem:[#allocation2 + $0x8] sm:$0xff]  ;;  %3555 = vmatpush3.bf16.msra.mxu1 %v3866_v36  ;;  %v941_v40 = vld [vmem:[#allocation2 + $0x10] sm:$0xff]  ;;  %s4065_s18 = smov 104   ;;  %p3430_p5 = scmp.ne.s32.totalorder %s4184_s22, 1 }
 0x109   : > { %v945_v39 = vpack.c.bf16 %v940_v38, %v939_v37  ;;  %v946_v42 = vpack.c.bf16 %v942_v41, %v941_v40 }
 0x10b   : > { %3557 = vmatmul.mubr.msk.bf16.vlgmr.msra.gmra.mxu1 %vm971_vm4, %v945_v39 }
 0x10c   : > { %3560 = vmatprep.mubr.msk.bf16.mxu1 %vm4054_vm3, %v4053_v35 }
 0x113   : > { %3561 = vmatmul.mubr.msk.bf16.gmra.mxu1 %vm971_vm4, %v946_v42 }
 0x114   : > { %3564 = vmatprep.mubr.msk.bf16.mxu1 %vm4054_vm3, %v4053_v35 }
 0x11b   : > { %3565 = vmatmul.mubr.msk.bf16.gmra.mxu1 %vm971_vm4, %v947_v45 }
 0x1cb   : > { %v1015_v46 = vpop.f32.mrf.mxu1 }
 0x1cc   : > { %v1016_v50 = vadd.f32 %v3368_v47, %v1015_v46 }
 0x1cd   : > { %v3558_v48 = vpop.f32.mrf.mxu1 }
 0x1cf   : > { %v1018_v49 = vpop.f32.mrf.mxu1 }
 0x1d0   : > { %v1019_v51 = vadd.f32 %v3368_v47, %v1018_v49 }
 0x1d1   : > { %v3559_v52 = vpop.f32.mrf.mxu1 }
 0x1d2   : > { %v4307_v53 = vpack.c.bf16 %v1019_v51, %v1016_v50 }
 0x1d3   : > { %v1023_v54 = vpop.f32.mrf.mxu1 }
 0x1d4   : > { %v1024_v55 = vadd.f32 %v3368_v47, %v1023_v54  ;;  %3572 = vmatprep.mubr.msk.bf16.mxu1 %vm1052_vm5, %v4307_v53 }
 0x1d5   : > { %v3562_v56 = vpop.f32.mrf.mxu1 }
 0x1d6   : > { %v4311_v57 = vpack.c.bf16 %v1024_v55, %v1024_v55 }
 0x1d7   : > { %v1026_v58 = vpop.f32.mrf.mxu1 }
 0x1d8   : > { %1050 = vrot.lane.b32.xlu0 %v4311_v57, %s4055_s17  ;;  %v1027_v61 = vadd.f32 %v3368_v47, %v1026_v58 }
 0x1d9   : > { %v3563_v59 = vpop.f32.mrf.mxu1 }
 0x1db   : > { %v1031_v60 = vpop.f32.mrf.mxu1 }
 0x1dc   : > { %v1032_v62 = vadd.f32 %v3368_v47, %v1031_v60  ;;  %1048 = vrot.lane.b32.xlu0 %v4307_v53, %s4055_s17 }
 0x1dd   : > { %v3566_v63 = vpop.f32.mrf.mxu1 }
 0x1de   : > { %v4315_v0 = vpack.c.bf16 %v1032_v62, %v1027_v61 }
 0x1df   : > { %v1034_v1 = vpop.f32.mrf.mxu1 }
 0x1e0   : > { %v1035_v2 = vadd.f32 %v3368_v47, %v1034_v1  ;;  %3580 = vmatprep.mubr.msk.bf16.mxu0 %vm1052_vm5, %v4315_v0 }
 0x1e1   : > { %v3567_v3 = vpop.f32.mrf.mxu1 }
 0x1e2   : > { %v4319_v4 = vpack.c.bf16 %v1035_v2, %v1035_v2 }
 0x1e4   : > { %1117 = vrot.lane.b32.xlu1 %v4319_v4, %s4055_s17 }
 0x1e8   : > { %1115 = vrot.lane.b32.xlu1 %v4315_v0, %s4055_s17  ;;  %s4066_s17 = smov 40  }
 0x24a   : > { %v1051_v5 = vpop.permute.xlu0 %1050 }
 0x24b   : > { %3756 = vmatprep.subr.msk.bf16.mxu1 %vm1052_vm5, %v1051_v5  ;;  %v1063_v6 = vsel %vm1052_vm5, %v1051_v5, 0 }
 0x24c   : > { %3569 = vmatpush3.bf16.xpose.msra.mxu1 %v1063_v6 }
 0x24e   : > { %v1049_v7 = vpop.permute.xlu0 %1048 }
 0x24f   : > { %3757 = vmatprep.subr.msk.bf16.mxu1 %vm1052_vm5, %v1049_v7  ;;  %v1060_v8 = vsel %vm1052_vm5, %v1049_v7, 0 }
 0x254   : > { %3571 = vmatpush3.bf16.xpose.msra.mxu1 %v1060_v8 }
 0x256   : > { %v1118_v9 = vpop.permute.xlu1 %1117 }
 0x257   : > { %3758 = vmatprep.subr.msk.bf16.mxu0 %vm1052_vm5, %v1118_v9  ;;  %v1129_v10 = vsel %vm1052_vm5, %v1118_v9, 0 }
 0x258   : > { %3577 = vmatpush3.bf16.xpose.msra.mxu0 %v1129_v10 }
 0x25a   : > { %v1116_v11 = vpop.permute.xlu1 %1115 }
 0x25b   : > { %3573 = vmatmul.mubr.msk.bf16.vlgmr.msra.gmra.mxu1 %vm1052_vm5, %v4311_v57  ;;  %3759 = vmatprep.subr.msk.bf16.mxu0 %vm1052_vm5, %v1116_v11  ;;  %v1126_v12 = vsel %vm1052_vm5, %v1116_v11, 0 }
 0x260   : > { %3579 = vmatpush3.bf16.xpose.msra.mxu0 %v1126_v12 }
 0x267   : > { %3581 = vmatmul.mubr.msk.bf16.vlgmr.msra.gmra.mxu0 %vm1052_vm5, %v4319_v4 }
 0x31b   : > { %v3574_v15 = vpop.f32.mrf.mxu1 }
 0x31c   : > { %v1181_v17 = vmul.f32 0.35355338, %v3574_v15 }
 0x31d   : > { %v1099_v16 = vpop.f32.mrf.mxu1 }
 0x31e   : > { %v1179_v18 = vmul.f32 0.35355338, %v1099_v16  ;;  %v1187_v26 = vadd.f32 %v1181_v17, %v4335_v21 }
 0x31f   : > { %v3575_v19 = vpop.f32.mrf.mxu1 }
 0x320   : > { %v1185_v22 = vadd.f32 %v1179_v18, %v4335_v21  ;;  %v1198_v28 = vsel %vm1191_vm7, %v1187_v26, -inf }
 0x321   : > { %v1102_v23 = vpop.f32.mrf.mxu1 }
 0x322   : > { %v1180_v24 = vmul.f32 0.35355338, %v1102_v23  ;;  %v1192_v25 = vsel %vm1191_vm7, %v1185_v22, -inf }
 0x323   : > { %1193 = vmax.xlane.f32.xlu0 %v1192_v25 }
 0x324   : > { %v1186_v27 = vadd.f32 %v1180_v24, %v4335_v21 }
 0x326   : > { %v1195_v29 = vsel %vm1191_vm7, %v1186_v27, -inf }
 0x327   : > { %v3582_v30 = vpop.f32.mrf.mxu0  ;;  %1199 = vmax.xlane.f32.xlu0 %v1198_v28  ;;  %1196 = vmax.xlane.f32.xlu1 %v1195_v29 }
 0x328   : > { %v1184_v32 = vmul.f32 0.35355338, %v3582_v30 }
 0x329   : > { %v1165_v31 = vpop.f32.mrf.mxu0 }
 0x32a   : > { %v1182_v33 = vmul.f32 0.35355338, %v1165_v31  ;;  %v1190_v38 = vadd.f32 %v1184_v32, %v4335_v21 }
 0x32b   : > { %v3583_v34 = vpop.f32.mrf.mxu0 }
 0x32c   : > { %v1188_v36 = vadd.f32 %v1182_v33, %v4335_v21  ;;  %v1207_v39 = vsel %vm1191_vm7, %v1190_v38, -inf }
 0x32d   : > { %v1168_v40 = vpop.f32.mrf.mxu0 }
 0x32e   : > { %v1201_v37 = vsel %vm1191_vm7, %v1188_v36, -inf  ;;  %v1183_v41 = vmul.f32 0.35355338, %v1168_v40 }
 0x32f   : > { %1202 = vmax.xlane.f32.xlu0 %v1201_v37 }
 0x330   : > { %v1189_v42 = vadd.f32 %v1183_v41, %v4335_v21 }
 0x332   : > { %v1204_v43 = vsel %vm1191_vm7, %v1189_v42, -inf }
 0x333   : > { %1208 = vmax.xlane.f32.xlu0 %v1207_v39 }
 0x338   : > { %1264 = vrot.lane.b32.xlu1 %v4311_v57, %s4057_s3 }
 0x33c   : > { %1393 = vrot.lane.b32.xlu1 %v4311_v57, %s4058_s19 }
 0x349   : > { %1262 = vrot.lane.b32.xlu0 %v4307_v53, %s4057_s3 }
 0x34d   : > { %1325 = vrot.lane.b32.xlu0 %v4315_v0, %s4057_s3 }
 0x360   : > { %1205 = vmax.xlane.f32.xlu1 %v1204_v43 }
 0x371   : > { %1327 = vrot.lane.b32.xlu1 %v4319_v4, %s4057_s3  ;;  %s4067_s3 = smov 8  }
 0x3ac   : > { %v1194_v44 = vpop.xlane.xlu0 %1193 }
 0x3ad   : > { %v1210_v45 = vsub.f32 %v1185_v22, %v1194_v44 }
 0x3af   : > { %v1216_v50 = vmul.f32 1.442695, %v1210_v45 }
 0x3b0   : > { %v1200_v46 = vpop.xlane.xlu0 %1199  ;;  %v1197_v47 = vpop.xlane.xlu1 %1196 }
 0x3b1   : > { %v1212_v48 = vsub.f32 %v1187_v26, %v1200_v46  ;;  %v1211_v49 = vsub.f32 %v1186_v27, %v1197_v47 }
 0x3b3   : > { %v1220_v51 = vmul.f32 1.442695, %v1212_v48  ;;  %v1218_v52 = vmul.f32 1.442695, %v1211_v49 }
 0x3b4   : > { %v1265_v54 = vpop.permute.xlu1 %1264 }
 0x3b5   : > { %3875 = vpow2.f32 %v1220_v51  ;;  %3760 = vmatprep.subr.msk.bf16.mxu1 %vm1273_vm8, %v1265_v54  ;;  %v1275_v55 = vsel %vm1273_vm8, %v1265_v54, 0 }
 0x3b6   : > { %3877 = vpow2.f32 %v1218_v52  ;;  %3585 = vmatpush3.bf16.msra.mxu1 %v1275_v55 }
 0x3b7   : > { %3879 = vpow2.f32 %v1216_v50 }
 0x3b8   : > { %v1203_v56 = vpop.xlane.xlu0 %1202  ;;  %v1394_v58 = vpop.permute.xlu1 %1393 }
 0x3b9   : > { %3762 = vmatprep.subr.msk.bf16.mxu0 %vm1052_vm5, %v1394_v58  ;;  %v1405_v59 = vsel %vm1052_vm5, %v1394_v58, 0  ;;  %v1213_v60 = vsub.f32 %v1188_v36, %v1203_v56 }
 0x3ba   : > { %3601 = vmatpush3.bf16.xpose.msra.mxu0 %v1405_v59 }
 0x3bb   : > { %v1222_v63 = vmul.f32 1.442695, %v1213_v60 }
 0x3bc   : > { %v1209_v61 = vpop.xlane.xlu0 %1208 }
 0x3bd   : > { %v1215_v62 = vsub.f32 %v1190_v38, %v1209_v61 }
 0x3bf   : > { %v1226_v1 = vmul.f32 1.442695, %v1215_v62 }
 0x3c0   : > { %v1263_v2 = vpop.permute.xlu0 %1262 }
 0x3c1   : > { %3881 = vpow2.f32 %v1226_v1  ;;  %3586 = vmatprep.subr.bf16.mxu1 %v1263_v2 }
 0x3c2   : > { %v3876_v3 = vpop.eup %3875  ;;  %3587 = vmatpush3.bf16.msra.mxu1 %v1263_v2  ;;  %3883 = vpow2.f32 %v1222_v63 }
 0x3c3   : > { %v3878_v5 = vpop.eup %3877  ;;  %v1234_v6 = vsel %vm1191_vm7, %v3876_v3, 0.0 }
 0x3c4   : > { %v3880_v7 = vpop.eup %3879  ;;  %1235 = vadd.xlane.f32.xlu1 %v1234_v6  ;;  %v1231_v8 = vsel %vm1191_vm7, %v3878_v5, 0.0  ;;  %v1326_v20 = vpop.permute.xlu0 %1325 }
 0x3c5   : > { %1232 = vadd.xlane.f32.xlu0 %v1231_v8  ;;  %v1228_v9 = vsel %vm1191_vm7, %v3880_v7, 0.0 }
 0x3c8   : > { %1229 = vadd.xlane.f32.xlu1 %v1228_v9 }
 0x3ce   : > { %v4362_v10 = vpop.eup %3881 }
 0x3cf   : > { %v1243_v11 = vsel %vm1191_vm7, %v4362_v10, 0.0  ;;  %v3884_v12 = vpop.eup %3883 }
 0x3d0   : > { %1244 = vadd.xlane.f32.xlu0 %v1243_v11  ;;  %v1237_v13 = vsel %vm1191_vm7, %v3884_v12, 0.0 }
 0x3d4   : > { %1238 = vadd.xlane.f32.xlu0 %v1237_v13 }
 0x3d9   : > { %1391 = vrot.lane.b32.xlu1 %v4307_v53, %s4058_s19 }
 0x3e9   : > { %v1206_v14 = vpop.xlane.xlu1 %1205 }
 0x3ea   : > { %v1214_v15 = vsub.f32 %v1189_v42, %v1206_v14  ;;  %1461 = vrot.lane.b32.xlu0 %v4319_v4, %s4058_s19 }
 0x3ec   : > { %v1224_v16 = vmul.f32 1.442695, %v1214_v15 }
 0x3ed   : > { %v1328_v17 = vpop.permute.xlu1 %1327 }
 0x3ee   : > { %3885 = vpow2.f32 %v1224_v16  ;;  %1389 = vrot.lane.b32.xlu0 %v4311_v57, %s4059_s27  ;;  %3761 = vmatprep.subr.msk.bf16.mxu1 %vm1273_vm8, %v1328_v17  ;;  %v1337_v38 = vsel %vm1273_vm8, %v1328_v17, 0 }
 0x3f2   : > { %1455 = vrot.lane.b32.xlu0 %v4315_v0, %s4059_s27 }
 0x3fb   : > { %v3886_v18 = vpop.eup %3885 }
 0x3fc   : > { %v1240_v19 = vsel %vm1191_vm7, %v3886_v18, 0.0 }
 0x3fd   : > { %1241 = vadd.xlane.f32.xlu1 %v1240_v19 }
 0x40e   : > { %1387 = vrot.lane.b32.xlu1 %v4307_v53, %s4059_s27 }
 0x412   : > { %1459 = vrot.lane.b32.xlu1 %v4315_v0, %s4058_s19  ;;  %s4068_s19 = smov 16  }
 0x416   : > { %1457 = vrot.lane.b32.xlu1 %v4319_v4, %s4059_s27  ;;  %s4069_s27 = smov 24  }
 0x44d   : > { %v1236_v22 = vpop.xlane.xlu1 %1235 }
 0x44e   : > { %v1233_v23 = vpop.xlane.xlu0 %1232  ;;  %3887 = vrcp.f32 %v1236_v22 }
 0x44f   : > { %3889 = vrcp.f32 %v1233_v23 }
 0x451   : > { %v1230_v24 = vpop.xlane.xlu1 %1229 }
 0x452   : > { %3891 = vrcp.f32 %v1230_v24 }
 0x455   : > { %v1392_v25 = vpop.permute.xlu1 %1391 }
 0x456   : > { %3763 = vmatprep.subr.msk.bf16.mxu0 %vm1052_vm5, %v1392_v25  ;;  %v1402_v26 = vsel %vm1052_vm5, %v1392_v25, 0 }
 0x457   : > { %3603 = vmatpush3.bf16.xpose.msra.mxu0 %v1402_v26 }
 0x459   : > { %v1245_v29 = vpop.xlane.xlu0 %1244 }
 0x45a   : > { %3893 = vrcp.f32 %v1245_v29 }
 0x45b   : > { %v3888_v27 = vpop.eup %3887 }
 0x45c   : > { %v3890_v28 = vpop.eup %3889  ;;  %v1254_v31 = vmul.f32 %v3888_v27, %v3876_v3 }
 0x45d   : > { %v1253_v33 = vmul.f32 %v3890_v28, %v3878_v5  ;;  %v1239_v37 = vpop.xlane.xlu0 %1238 }
 0x45e   : > { %v1259_v36 = vpack.c.bf16 %v1254_v31, %v1254_v31  ;;  %3895 = vrcp.f32 %v1239_v37 }
 0x45f   : > { %v3892_v30 = vpop.eup %3891 }
 0x460   : > { %v1252_v32 = vmul.f32 %v3892_v30, %v3880_v7 }
 0x461   : > { %v1462_v39 = vpop.permute.xlu0 %1461 }
 0x462   : > { %v1258_v34 = vpack.c.bf16 %v1253_v33, %v1252_v32  ;;  %v1473_v52 = vsel %vm1052_vm5, %v1462_v39, 0 }
 0x464   : > { %3588 = vmatprep.mubr.msk.bf16.mxu1 %vm1191_vm7, %v1258_v34 }
 0x465   : > { %3589 = vmatmul.mubr.msk.bf16.vlgmr.msra.gmra.mxu1 %vm1191_vm7, %v1259_v36  ;;  %v1390_v42 = vpop.permute.xlu0 %1389 }
 0x466   : > { %3593 = vmatpush3.bf16.msra.mxu1 %v1337_v38 }
 0x467   : > { %3594 = vmatprep.subr.bf16.mxu1 %v1326_v20  ;;  %v3894_v43 = vpop.eup %3893 }
 0x468   : > { %v1257_v46 = vmul.f32 %v3894_v43, %v4362_v10 }
 0x469   : > { %v1456_v51 = vpop.permute.xlu0 %1455 }
 0x46a   : > { %3595 = vmatpush3.bf16.msra.mxu1 %v1326_v20  ;;  %v1261_v50 = vpack.c.bf16 %v1257_v46, %v1257_v46 }
 0x46b   : > { %3764 = vmatprep.subr.msk.bf16.mxu1 %vm1052_vm5, %v1462_v39  ;;  %v3896_v44 = vpop.eup %3895 }
 0x46c   : > { %v1255_v47 = vmul.f32 %v3896_v44, %v3884_v12 }
 0x486   : > { %v1242_v40 = vpop.xlane.xlu1 %1241 }
 0x487   : > { %3897 = vrcp.f32 %v1242_v40 }
 0x48a   : > { %v1388_v41 = vpop.permute.xlu1 %1387 }
 0x48b   : > { %3604 = vmatprep.mubr.msk.bf16.mxu0 %vm1052_vm5, %v1388_v41 }
 0x48c   : > { %3605 = vmatmul.mubr.msk.bf16.vlgmr.msra.gmra.mxu0 %vm1052_vm5, %v1390_v42 }
 0x48e   : > { %v1460_v54 = vpop.permute.xlu1 %1459 }
 0x48f   : > { %v1470_v55 = vsel %vm1052_vm5, %v1460_v54, 0 }
 0x492   : > { %v1458_v56 = vpop.permute.xlu1 %1457 }
 0x494   : > { %v3898_v45 = vpop.eup %3897 }
 0x495   : > { %v1256_v48 = vmul.f32 %v3898_v45, %v3886_v18 }
 0x497   : > { %v1260_v49 = vpack.c.bf16 %v1256_v48, %v1255_v47 }
 0x499   : > { %3596 = vmatprep.mubr.msk.bf16.mxu1 %vm1191_vm7, %v1260_v49 }
 0x49a   : > { %3597 = vmatmul.mubr.msk.bf16.vlgmr.msra.gmra.mxu1 %vm1191_vm7, %v1261_v50 }
 0x49b   : > { %3609 = vmatpush3.bf16.xpose.msra.mxu1 %v1473_v52  ;;  %3612 = vmatprep.mubr.msk.bf16.mxu1 %vm1052_vm5, %v1456_v51 }
 0x49c   : > { %3765 = vmatprep.subr.msk.bf16.mxu1 %vm1052_vm5, %v1460_v54 }
 0x4a3   : > { %3611 = vmatpush3.bf16.xpose.msra.mxu1 %v1470_v55 }
 0x4aa   : > { %3613 = vmatmul.mubr.msk.bf16.vlgmr.msra.gmra.mxu1 %vm1052_vm5, %v1458_v56 }
 0x525   : > { %v4395_v58 = vpop.f32.mrf.mxu1 }
 0x527   : > { %v4397_v59 = vpop.f32.mrf.mxu1 }
 0x529   : > { %v3591_v60 = vpop.f32.mrf.mxu1 }
 0x52b   : > { %v4405_v12 = vpop.f32.mrf.mxu1 }
 0x54c   : > { %v3606_v61 = vpop.f32.mrf.mxu0 }
 0x54d   : > { %v1525_v63 = vmul.f32 0.35355338, %v3606_v61 }
 0x54e   : > { %v1441_v62 = vpop.f32.mrf.mxu0 }
 0x54f   : > { %v1523_v1 = vmul.f32 0.35355338, %v1441_v62  ;;  %v1531_v8 = vadd.f32 %v1525_v63, %v4335_v21 }
 0x550   : > { %v3607_v2 = vpop.f32.mrf.mxu0 }
 0x551   : > { %v1529_v3 = vadd.f32 %v1523_v1, %v4335_v21  ;;  %v1541_v10 = vsel %vm1191_vm7, %v1531_v8, -inf }
 0x552   : > { %v1444_v5 = vpop.f32.mrf.mxu0 }
 0x553   : > { %v1524_v6 = vmul.f32 0.35355338, %v1444_v5  ;;  %v1535_v7 = vsel %vm1191_vm7, %v1529_v3, -inf }
 0x554   : > { %1536 = vmax.xlane.f32.xlu0 %v1535_v7 }
 0x555   : > { %v1530_v9 = vadd.f32 %v1524_v6, %v4335_v21 }
 0x557   : > { %v1538_v11 = vsel %vm1191_vm7, %v1530_v9, -inf }
 0x558   : > { %1542 = vmax.xlane.f32.xlu0 %v1541_v10  ;;  %1539 = vmax.xlane.f32.xlu1 %v1538_v11 }
 0x55a   : > { %v4407_v13 = vpop.f32.mrf.mxu1 }
 0x55c   : > { %v4409_v14 = vpop.f32.mrf.mxu1 }
 0x55e   : > { %v3599_v15 = vpop.f32.mrf.mxu1 }
 0x560   : > { %v4411_v16 = vpop.f32.mrf.mxu1 }
 0x56a   : > { %v3614_v17 = vpop.f32.mrf.mxu1 }
 0x56b   : > { %v1528_v19 = vmul.f32 0.35355338, %v3614_v17 }
 0x56c   : > { %v1509_v18 = vpop.f32.mrf.mxu1 }
 0x56d   : > { %v1526_v20 = vmul.f32 0.35355338, %v1509_v18  ;;  %v1534_v27 = vadd.f32 %v1528_v19, %v4335_v21 }
 0x56e   : > { %v3615_v22 = vpop.f32.mrf.mxu1 }
 0x56f   : > { %v1532_v23 = vadd.f32 %v1526_v20, %v4335_v21  ;;  %v1550_v29 = vsel %vm1191_vm7, %v1534_v27, -inf }
 0x570   : > { %v1512_v24 = vpop.f32.mrf.mxu1 }
 0x571   : > { %v1527_v25 = vmul.f32 0.35355338, %v1512_v24  ;;  %v1544_v26 = vsel %vm1191_vm7, %v1532_v23, -inf }
 0x572   : > { %1545 = vmax.xlane.f32.xlu0 %v1544_v26 }
 0x573   : > { %v1533_v28 = vadd.f32 %v1527_v25, %v4335_v21 }
 0x575   : > { %v1547_v30 = vsel %vm1191_vm7, %v1533_v28, -inf }
 0x576   : > { %1551 = vmax.xlane.f32.xlu0 %v1550_v29  ;;  %1548 = vmax.xlane.f32.xlu1 %v1547_v30 }
 0x5dd   : > { %v1537_v31 = vpop.xlane.xlu0 %1536 }
 0x5de   : > { %v1553_v32 = vsub.f32 %v1529_v3, %v1537_v31 }
 0x5e0   : > { %v1559_v33 = vmul.f32 1.442695, %v1553_v32 }
 0x5e1   : > { %v1543_v34 = vpop.xlane.xlu0 %1542  ;;  %v1540_v36 = vpop.xlane.xlu1 %1539 }
 0x5e2   : > { %3899 = vpow2.f32 %v1559_v33  ;;  %v1555_v37 = vsub.f32 %v1531_v8, %v1543_v34  ;;  %v1554_v38 = vsub.f32 %v1530_v9, %v1540_v36 }
 0x5e4   : > { %v1563_v39 = vmul.f32 1.442695, %v1555_v37  ;;  %v1561_v40 = vmul.f32 1.442695, %v1554_v38 }
 0x5e6   : > { %3901 = vpow2.f32 %v1563_v39 }
 0x5e7   : > { %3903 = vpow2.f32 %v1561_v40 }
 0x5ef   : > { %v4419_v41 = vpop.eup %3899 }
 0x5f0   : > { %v1571_v42 = vsel %vm1191_vm7, %v4419_v41, 0.0 }
 0x5f1   : > { %1572 = vadd.xlane.f32.xlu1 %v1571_v42 }
 0x5f3   : > { %v4423_v43 = vpop.eup %3901 }
 0x5f4   : > { %v4425_v44 = vpop.eup %3903  ;;  %v1577_v45 = vsel %vm1191_vm7, %v4423_v43, 0.0 }
 0x5f5   : > { %1578 = vadd.xlane.f32.xlu1 %v1577_v45  ;;  %v1574_v46 = vsel %vm1191_vm7, %v4425_v44, 0.0 }
 0x5f6   : > { %1575 = vadd.xlane.f32.xlu0 %v1574_v46 }
 0x5fb   : > { %v1546_v47 = vpop.xlane.xlu0 %1545 }
 0x5fc   : > { %v1556_v50 = vsub.f32 %v1532_v23, %v1546_v47 }
 0x5fe   : > { %v1565_v55 = vmul.f32 1.442695, %v1556_v50 }
 0x5ff   : > { %v1552_v48 = vpop.xlane.xlu0 %1551  ;;  %v1549_v52 = vpop.xlane.xlu1 %1548 }
 0x600   : > { %v1558_v49 = vsub.f32 %v1534_v27, %v1552_v48  ;;  %v1557_v54 = vsub.f32 %v1533_v28, %v1549_v52 }
 0x602   : > { %v1569_v51 = vmul.f32 1.442695, %v1558_v49  ;;  %v1567_v56 = vmul.f32 1.442695, %v1557_v54 }
 0x604   : > { %3905 = vpow2.f32 %v1569_v51 }
 0x605   : > { %3907 = vpow2.f32 %v1565_v55 }
 0x606   : > { %1607 = vrot.lane.b32.xlu1 %v4311_v57, %s4060_s29  ;;  %3909 = vpow2.f32 %v1567_v56 }
 0x60a   : > { %1735 = vrot.lane.b32.xlu1 %v4311_v57, %s4061_s6 }
 0x60c   : > { %1605 = vrot.lane.b32.xlu0 %v4307_v53, %s4060_s29 }
 0x60e   : > { %1669 = vrot.lane.b32.xlu1 %v4319_v4, %s4060_s29 }
 0x610   : > { %1667 = vrot.lane.b32.xlu0 %v4315_v0, %s4060_s29 }
 0x611   : > { %v4437_v60 = vpop.eup %3905 }
 0x612   : > { %1733 = vrot.lane.b32.xlu1 %v4307_v53, %s4061_s6  ;;  %v1586_v61 = vsel %vm1191_vm7, %v4437_v60, 0.0  ;;  %v4441_v62 = vpop.eup %3907 }
 0x613   : > { %v4443_v63 = vpop.eup %3909  ;;  %v1580_v1 = vsel %vm1191_vm7, %v4441_v62, 0.0 }
 0x614   : > { %v1583_v2 = vsel %vm1191_vm7, %v4443_v63, 0.0 }
 0x62f   : > { %1587 = vadd.xlane.f32.xlu0 %v1586_v61 }
 0x633   : > { %1581 = vadd.xlane.f32.xlu0 %v1580_v1 }
 0x636   : > { %1584 = vadd.xlane.f32.xlu1 %v1583_v2 }
 0x647   : > { %1729 = vrot.lane.b32.xlu1 %v4307_v53, %s4062_s30 }
 0x649   : > { %1803 = vrot.lane.b32.xlu0 %v4319_v4, %s4061_s6 }
 0x64b   : > { %1801 = vrot.lane.b32.xlu1 %v4315_v0, %s4061_s6  ;;  %s4890_s6 = scalar_lea.vmem %s4851_s7, %s4190_s23 }
 0x64d   : > { %1731 = vrot.lane.b32.xlu0 %v4311_v57, %s4062_s30 }
 0x64f   : > { %1799 = vrot.lane.b32.xlu1 %v4319_v4, %s4062_s30 }
 0x651   : > { %1797 = vrot.lane.b32.xlu0 %v4315_v0, %s4062_s30 }
 0x67a   : > { %v1573_v3 = vpop.xlane.xlu1 %1572 }
 0x67b   : > { %3911 = vrcp.f32 %v1573_v3 }
 0x67e   : > { %v1579_v5 = vpop.xlane.xlu1 %1578 }
 0x67f   : > { %v1576_v6 = vpop.xlane.xlu0 %1575  ;;  %3913 = vrcp.f32 %v1579_v5 }
 0x680   : > { %3915 = vrcp.f32 %v1576_v6 }
 0x682   : > { %v1608_v7 = vpop.permute.xlu1 %1607 }
 0x683   : > { %v1617_v8 = vsel %vm1273_vm8, %v1608_v7, 0  ;;  %3766 = vmatprep.subr.msk.bf16.mxu0 %vm1273_vm8, %v1608_v7  ;;  %v1606_v9 = vpop.permute.xlu0 %1605 }
 0x684   : > { %3617 = vmatpush3.bf16.msra.mxu0 %v1617_v8 }
 0x685   : > { %3618 = vmatprep.subr.bf16.mxu0 %v1606_v9 }
 0x686   : > { %v1736_v10 = vpop.permute.xlu1 %1735 }
 0x687   : > { %v1668_v19 = vpop.permute.xlu0 %1667  ;;  %v1747_v27 = vsel %vm1052_vm5, %v1736_v10, 0 }
 0x688   : > { %3619 = vmatpush3.bf16.msra.mxu0 %v1606_v9  ;;  %v3912_v15 = vpop.eup %3911 }
 0x689   : > { %3768 = vmatprep.subr.msk.bf16.mxu0 %vm1052_vm5, %v1736_v10  ;;  %v1595_v23 = vmul.f32 %v3912_v15, %v4419_v41 }
 0x68a   : > { %v1670_v11 = vpop.permute.xlu1 %1669 }
 0x68b   : > { %v1679_v17 = vsel %vm1273_vm8, %v1670_v11, 0  ;;  %3767 = vmatprep.subr.msk.bf16.mxu1 %vm1273_vm8, %v1670_v11 }
 0x68c   : > { %v3914_v18 = vpop.eup %3913  ;;  %3625 = vmatpush3.bf16.msra.mxu1 %v1679_v17 }
 0x68d   : > { %v3916_v20 = vpop.eup %3915  ;;  %3626 = vmatprep.subr.bf16.mxu1 %v1668_v19  ;;  %v1597_v22 = vmul.f32 %v3914_v18, %v4423_v43 }
 0x68e   : > { %v1596_v24 = vmul.f32 %v3916_v20, %v4425_v44  ;;  %v1734_v28 = vpop.permute.xlu1 %1733 }
 0x68f   : > { %v1602_v25 = vpack.c.bf16 %v1597_v22, %v1597_v22  ;;  %v1744_v29 = vsel %vm1052_vm5, %v1734_v28, 0 }
 0x690   : > { %3627 = vmatpush3.bf16.msra.mxu1 %v1668_v19  ;;  %v1601_v26 = vpack.c.bf16 %v1596_v24, %v1595_v23 }
 0x692   : > { %3620 = vmatprep.mubr.msk.bf16.mxu0 %vm1191_vm7, %v1601_v26 }
 0x693   : > { %3621 = vmatmul.mubr.msk.bf16.vlgmr.msra.gmra.mxu0 %vm1191_vm7, %v1602_v25 }
 0x694   : > { %3633 = vmatpush3.bf16.xpose.msra.mxu0 %v1747_v27 }
 0x695   : > { %3769 = vmatprep.subr.msk.bf16.mxu0 %vm1052_vm5, %v1734_v28 }
 0x69c   : > { %3635 = vmatpush3.bf16.xpose.msra.mxu0 %v1744_v29 }
 0x6b8   : > { %v1588_v30 = vpop.xlane.xlu0 %1587 }
 0x6b9   : > { %3917 = vrcp.f32 %v1588_v30 }
 0x6bc   : > { %v1582_v31 = vpop.xlane.xlu0 %1581 }
 0x6bd   : > { %3919 = vrcp.f32 %v1582_v31 }
 0x6bf   : > { %v1585_v32 = vpop.xlane.xlu1 %1584 }
 0x6c0   : > { %v1804_v33 = vpop.permute.xlu0 %1803  ;;  %3921 = vrcp.f32 %v1585_v32 }
 0x6c1   : > { %3770 = vmatprep.subr.msk.bf16.mxu1 %vm1052_vm5, %v1804_v33  ;;  %v1815_v45 = vsel %vm1052_vm5, %v1804_v33, 0 }
 0x6c3   : > { %v1730_v34 = vpop.permute.xlu1 %1729 }
 0x6c4   : > { %v1732_v36 = vpop.permute.xlu0 %1731  ;;  %3636 = vmatprep.mubr.msk.bf16.mxu0 %vm1052_vm5, %v1730_v34 }
 0x6c5   : > { %3637 = vmatmul.mubr.msk.bf16.vlgmr.msra.gmra.mxu0 %vm1052_vm5, %v1732_v36 }
 0x6c6   : > { %v3918_v37 = vpop.eup %3917 }
 0x6c7   : > { %v1600_v40 = vmul.f32 %v3918_v37, %v4437_v60  ;;  %v1802_v47 = vpop.permute.xlu1 %1801 }
 0x6c8   : > { %v1798_v46 = vpop.permute.xlu0 %1797  ;;  %v1812_v48 = vsel %vm1052_vm5, %v1802_v47, 0 }
 0x6c9   : > { %v1604_v44 = vpack.c.bf16 %v1600_v40, %v1600_v40 }
 0x6ca   : > { %v3920_v38 = vpop.eup %3919 }
 0x6cb   : > { %v1598_v41 = vmul.f32 %v3920_v38, %v4441_v62  ;;  %v1800_v49 = vpop.permute.xlu1 %1799 }
 0x6cd   : > { %v3922_v39 = vpop.eup %3921 }
 0x6ce   : > { %v1599_v42 = vmul.f32 %v3922_v39, %v4443_v63 }
 0x6d0   : > { %v1603_v43 = vpack.c.bf16 %v1599_v42, %v1598_v41 }
 0x6d2   : > { %3628 = vmatprep.mubr.msk.bf16.mxu1 %vm1191_vm7, %v1603_v43 }
 0x6d3   : > { %3629 = vmatmul.mubr.msk.bf16.vlgmr.msra.gmra.mxu1 %vm1191_vm7, %v1604_v44 }
 0x6d4   : > { %3641 = vmatpush3.bf16.xpose.msra.mxu1 %v1815_v45  ;;  %3644 = vmatprep.mubr.msk.bf16.mxu1 %vm1052_vm5, %v1798_v46 }
 0x6d5   : > { %3771 = vmatprep.subr.msk.bf16.mxu1 %vm1052_vm5, %v1802_v47 }
 0x6dc   : > { %3643 = vmatpush3.bf16.xpose.msra.mxu1 %v1812_v48 }
 0x6e3   : > { %3645 = vmatmul.mubr.msk.bf16.vlgmr.msra.gmra.mxu1 %vm1052_vm5, %v1800_v49 }
 0x753   : > { %v4481_v50 = vpop.f32.mrf.mxu0 }
 0x755   : > { %v4483_v51 = vpop.f32.mrf.mxu0 }
 0x757   : > { %v3623_v52 = vpop.f32.mrf.mxu0 }
 0x759   : > { %v4485_v54 = vpop.f32.mrf.mxu0 }
 0x75a   : > { %v3820_v55 = vpack.i.bf16 %v4485_v54, %v4483_v51 }
 0x785   : > { %v3638_v56 = vpop.f32.mrf.mxu0 }
 0x786   : > { %v1867_v61 = vmul.f32 0.35355338, %v3638_v56 }
 0x787   : > { %v1783_v60 = vpop.f32.mrf.mxu0 }
 0x788   : > { %v1865_v62 = vmul.f32 0.35355338, %v1783_v60  ;;  %v1873_v6 = vadd.f32 %v1867_v61, %v4335_v21 }
 0x789   : > { %v3639_v63 = vpop.f32.mrf.mxu0 }
 0x78a   : > { %v1871_v1 = vadd.f32 %v1865_v62, %v4335_v21  ;;  %v1883_v8 = vsel %vm1191_vm7, %v1873_v6, -inf }
 0x78b   : > { %v1786_v2 = vpop.f32.mrf.mxu0 }
 0x78c   : > { %v1866_v3 = vmul.f32 0.35355338, %v1786_v2  ;;  %v1877_v5 = vsel %vm1191_vm7, %v1871_v1, -inf }
 0x78d   : > { %1878 = vmax.xlane.f32.xlu0 %v1877_v5 }
 0x78e   : > { %v1872_v7 = vadd.f32 %v1866_v3, %v4335_v21 }
 0x790   : > { %v1880_v9 = vsel %vm1191_vm7, %v1872_v7, -inf }
 0x791   : > { %1884 = vmax.xlane.f32.xlu0 %v1883_v8  ;;  %1881 = vmax.xlane.f32.xlu1 %v1880_v9 }
 0x793   : > { %v4495_v10 = vpop.f32.mrf.mxu1 }
 0x795   : > { %v4497_v11 = vpop.f32.mrf.mxu1 }
 0x797   : > { %v3631_v15 = vpop.f32.mrf.mxu1 }
 0x799   : > { %v4499_v17 = vpop.f32.mrf.mxu1 }
 0x79a   : > { %v3850_v18 = vpack.i.bf16 %v4495_v10, %v4499_v17 }
 0x7a3   : > { %v3646_v19 = vpop.f32.mrf.mxu1 }
 0x7a4   : > { %v1870_v22 = vmul.f32 0.35355338, %v3646_v19 }
 0x7a5   : > { %v1851_v20 = vpop.f32.mrf.mxu1 }
 0x7a6   : > { %v1868_v23 = vmul.f32 0.35355338, %v1851_v20  ;;  %v1876_v29 = vadd.f32 %v1870_v22, %v4335_v21 }
 0x7a7   : > { %v3647_v24 = vpop.f32.mrf.mxu1 }
 0x7a8   : > { %v1874_v25 = vadd.f32 %v1868_v23, %v4335_v21  ;;  %v1892_v31 = vsel %vm1191_vm7, %v1876_v29, -inf }
 0x7a9   : > { %v1854_v26 = vpop.f32.mrf.mxu1 }
 0x7aa   : > { %v1869_v27 = vmul.f32 0.35355338, %v1854_v26  ;;  %v1886_v28 = vsel %vm1191_vm7, %v1874_v25, -inf }
 0x7ab   : > { %1887 = vmax.xlane.f32.xlu0 %v1886_v28 }
 0x7ac   : > { %v1875_v30 = vadd.f32 %v1869_v27, %v4335_v21 }
 0x7ae   : > { %v1889_v32 = vsel %vm1191_vm7, %v1875_v30, -inf }
 0x7af   : > { %1893 = vmax.xlane.f32.xlu0 %v1892_v31  ;;  %1890 = vmax.xlane.f32.xlu1 %v1889_v32 }
 0x816   : > { %v1879_v33 = vpop.xlane.xlu0 %1878 }
 0x817   : > { %v1895_v34 = vsub.f32 %v1871_v1, %v1879_v33 }
 0x819   : > { %v1901_v36 = vmul.f32 1.442695, %v1895_v34 }
 0x81a   : > { %v1885_v37 = vpop.xlane.xlu0 %1884  ;;  %v1882_v38 = vpop.xlane.xlu1 %1881 }
 0x81b   : > { %3923 = vpow2.f32 %v1901_v36  ;;  %v1897_v39 = vsub.f32 %v1873_v6, %v1885_v37  ;;  %v1896_v40 = vsub.f32 %v1872_v7, %v1882_v38 }
 0x81d   : > { %v1905_v41 = vmul.f32 1.442695, %v1897_v39  ;;  %v1903_v42 = vmul.f32 1.442695, %v1896_v40 }
 0x81f   : > { %3925 = vpow2.f32 %v1905_v41 }
 0x820   : > { %3927 = vpow2.f32 %v1903_v42 }
 0x828   : > { %v4509_v43 = vpop.eup %3923 }
 0x829   : > { %v1913_v44 = vsel %vm1191_vm7, %v4509_v43, 0.0 }
 0x82a   : > { %1914 = vadd.xlane.f32.xlu1 %v1913_v44 }
 0x82c   : > { %v4513_v45 = vpop.eup %3925 }
 0x82d   : > { %v4515_v46 = vpop.eup %3927  ;;  %v1919_v47 = vsel %vm1191_vm7, %v4513_v45, 0.0 }
 0x82e   : > { %1920 = vadd.xlane.f32.xlu1 %v1919_v47  ;;  %v1916_v48 = vsel %vm1191_vm7, %v4515_v46, 0.0 }
 0x82f   : > { %1917 = vadd.xlane.f32.xlu0 %v1916_v48 }
 0x834   : > { %v1888_v49 = vpop.xlane.xlu0 %1887 }
 0x835   : > { %v1898_v60 = vsub.f32 %v1874_v25, %v1888_v49 }
 0x837   : > { %v1907_v1 = vmul.f32 1.442695, %v1898_v60 }
 0x838   : > { %v1894_v52 = vpop.xlane.xlu0 %1893  ;;  %v1891_v62 = vpop.xlane.xlu1 %1890 }
 0x839   : > { %v1900_v56 = vsub.f32 %v1876_v29, %v1894_v52  ;;  %v1899_v63 = vsub.f32 %v1875_v30, %v1891_v62 }
 0x83b   : > { %v1911_v61 = vmul.f32 1.442695, %v1900_v56  ;;  %v1909_v2 = vmul.f32 1.442695, %v1899_v63 }
 0x83d   : > { %3929 = vpow2.f32 %v1911_v61 }
 0x83e   : > { %3931 = vpow2.f32 %v1907_v1 }
 0x83f   : > { %1949 = vrot.lane.b32.xlu1 %v4311_v57, %s4063_s4  ;;  %3933 = vpow2.f32 %v1909_v2 }
 0x843   : > { %2077 = vrot.lane.b32.xlu1 %v4311_v57, %s4064_s1 }
 0x845   : > { %1947 = vrot.lane.b32.xlu0 %v4307_v53, %s4063_s4 }
 0x847   : > { %2011 = vrot.lane.b32.xlu1 %v4319_v4, %s4063_s4 }
 0x849   : > { %2009 = vrot.lane.b32.xlu0 %v4315_v0, %s4063_s4  ;;  %s4891_s4 = scalar_lea.vmem %s4852_s8, %s4190_s23 }
 0x84a   : > { %v4527_v3 = vpop.eup %3929 }
 0x84b   : > { %2075 = vrot.lane.b32.xlu1 %v4307_v53, %s4064_s1  ;;  %v1928_v5 = vsel %vm1191_vm7, %v4527_v3, 0.0  ;;  %v4531_v6 = vpop.eup %3931 }
 0x84c   : > { %v4533_v7 = vpop.eup %3933  ;;  %v1922_v8 = vsel %vm1191_vm7, %v4531_v6, 0.0 }
 0x84d   : > { %v1925_v9 = vsel %vm1191_vm7, %v4533_v7, 0.0 }
 0x868   : > { %1929 = vadd.xlane.f32.xlu0 %v1928_v5 }
 0x86c   : > { %1923 = vadd.xlane.f32.xlu0 %v1922_v8 }
 0x86f   : > { %1926 = vadd.xlane.f32.xlu1 %v1925_v9 }
 0x880   : > { %2071 = vrot.lane.b32.xlu1 %v4307_v53, %s4065_s18 }
 0x882   : > { %2145 = vrot.lane.b32.xlu0 %v4319_v4, %s4064_s1 }
 0x884   : > { %2143 = vrot.lane.b32.xlu1 %v4315_v0, %s4064_s1 }
 0x886   : > { %2073 = vrot.lane.b32.xlu0 %v4311_v57, %s4065_s18 }
 0x888   : > { %2141 = vrot.lane.b32.xlu1 %v4319_v4, %s4065_s18 }
 0x88a   : > { %2139 = vrot.lane.b32.xlu0 %v4315_v0, %s4065_s18 }
 0x8b3   : > { %v1915_v15 = vpop.xlane.xlu1 %1914 }
 0x8b4   : > { %3935 = vrcp.f32 %v1915_v15 }
 0x8b7   : > { %v1921_v19 = vpop.xlane.xlu1 %1920 }
 0x8b8   : > { %v1918_v20 = vpop.xlane.xlu0 %1917  ;;  %3937 = vrcp.f32 %v1921_v19 }
 0x8b9   : > { %3939 = vrcp.f32 %v1918_v20 }
 0x8bb   : > { %v1950_v22 = vpop.permute.xlu1 %1949 }
 0x8bc   : > { %v1959_v23 = vsel %vm1273_vm8, %v1950_v22, 0  ;;  %3772 = vmatprep.subr.msk.bf16.mxu0 %vm1273_vm8, %v1950_v22  ;;  %v1948_v24 = vpop.permute.xlu0 %1947 }
 0x8bd   : > { %3649 = vmatpush3.bf16.msra.mxu0 %v1959_v23 }
 0x8be   : > { %3650 = vmatprep.subr.bf16.mxu0 %v1948_v24 }
 0x8bf   : > { %v2078_v25 = vpop.permute.xlu1 %2077 }
 0x8c0   : > { %v2010_v30 = vpop.permute.xlu0 %2009  ;;  %v2089_v38 = vsel %vm1052_vm5, %v2078_v25, 0 }
 0x8c1   : > { %3651 = vmatpush3.bf16.msra.mxu0 %v1948_v24  ;;  %v3936_v27 = vpop.eup %3935 }
 0x8c2   : > { %3774 = vmatprep.subr.msk.bf16.mxu0 %vm1052_vm5, %v2078_v25  ;;  %v1937_v33 = vmul.f32 %v3936_v27, %v4509_v43 }
 0x8c3   : > { %v2012_v26 = vpop.permute.xlu1 %2011 }
 0x8c4   : > { %v2021_v28 = vsel %vm1273_vm8, %v2012_v26, 0  ;;  %3773 = vmatprep.subr.msk.bf16.mxu1 %vm1273_vm8, %v2012_v26 }
 0x8c5   : > { %v3938_v29 = vpop.eup %3937  ;;  %3657 = vmatpush3.bf16.msra.mxu1 %v2021_v28 }
 0x8c6   : > { %v3940_v31 = vpop.eup %3939  ;;  %3658 = vmatprep.subr.bf16.mxu1 %v2010_v30  ;;  %v1939_v32 = vmul.f32 %v3938_v29, %v4513_v45 }
 0x8c7   : > { %v1938_v34 = vmul.f32 %v3940_v31, %v4515_v46  ;;  %v2076_v39 = vpop.permute.xlu1 %2075 }
 0x8c8   : > { %v1944_v36 = vpack.c.bf16 %v1939_v32, %v1939_v32  ;;  %v2086_v40 = vsel %vm1052_vm5, %v2076_v39, 0 }
 0x8c9   : > { %3659 = vmatpush3.bf16.msra.mxu1 %v2010_v30  ;;  %v1943_v37 = vpack.c.bf16 %v1938_v34, %v1937_v33 }
 0x8cb   : > { %3652 = vmatprep.mubr.msk.bf16.mxu0 %vm1191_vm7, %v1943_v37 }
 0x8cc   : > { %3653 = vmatmul.mubr.msk.bf16.vlgmr.msra.gmra.mxu0 %vm1191_vm7, %v1944_v36 }
 0x8cd   : > { %3665 = vmatpush3.bf16.xpose.msra.mxu0 %v2089_v38 }
 0x8ce   : > { %3775 = vmatprep.subr.msk.bf16.mxu0 %vm1052_vm5, %v2076_v39 }
 0x8d5   : > { %3667 = vmatpush3.bf16.xpose.msra.mxu0 %v2086_v40 }
 0x8f1   : > { %v1930_v41 = vpop.xlane.xlu0 %1929 }
 0x8f2   : > { %3941 = vrcp.f32 %v1930_v41 }
 0x8f5   : > { %v1924_v42 = vpop.xlane.xlu0 %1923 }
 0x8f6   : > { %3943 = vrcp.f32 %v1924_v42 }
 0x8f8   : > { %v1927_v43 = vpop.xlane.xlu1 %1926 }
 0x8f9   : > { %v2146_v44 = vpop.permute.xlu0 %2145  ;;  %3945 = vrcp.f32 %v1927_v43 }
 0x8fa   : > { %3776 = vmatprep.subr.msk.bf16.mxu1 %vm1052_vm5, %v2146_v44  ;;  %v2157_v63 = vsel %vm1052_vm5, %v2146_v44, 0 }
 0x8fc   : > { %v2072_v45 = vpop.permute.xlu1 %2071 }
 0x8fd   : > { %v2074_v46 = vpop.permute.xlu0 %2073  ;;  %3668 = vmatprep.mubr.msk.bf16.mxu0 %vm1052_vm5, %v2072_v45 }
 0x8fe   : > { %3669 = vmatmul.mubr.msk.bf16.vlgmr.msra.gmra.mxu0 %vm1052_vm5, %v2074_v46 }
 0x8ff   : > { %v3942_v47 = vpop.eup %3941 }
 0x900   : > { %v1942_v52 = vmul.f32 %v3942_v47, %v4527_v3  ;;  %v2144_v2 = vpop.permute.xlu1 %2143 }
 0x901   : > { %v2140_v1 = vpop.permute.xlu0 %2139  ;;  %v2154_v3 = vsel %vm1052_vm5, %v2144_v2, 0 }
 0x902   : > { %v1946_v62 = vpack.c.bf16 %v1942_v52, %v1942_v52 }
 0x903   : > { %v3944_v48 = vpop.eup %3943 }
 0x904   : > { %v1940_v56 = vmul.f32 %v3944_v48, %v4531_v6  ;;  %v2142_v5 = vpop.permute.xlu1 %2141 }
 0x906   : > { %v3946_v49 = vpop.eup %3945 }
 0x907   : > { %v1941_v60 = vmul.f32 %v3946_v49, %v4533_v7 }
 0x909   : > { %v1945_v61 = vpack.c.bf16 %v1941_v60, %v1940_v56 }
 0x90b   : > { %3660 = vmatprep.mubr.msk.bf16.mxu1 %vm1191_vm7, %v1945_v61 }
 0x90c   : > { %3661 = vmatmul.mubr.msk.bf16.vlgmr.msra.gmra.mxu1 %vm1191_vm7, %v1946_v62 }
 0x90d   : > { %3673 = vmatpush3.bf16.xpose.msra.mxu1 %v2157_v63  ;;  %3676 = vmatprep.mubr.msk.bf16.mxu1 %vm1052_vm5, %v2140_v1 }
 0x90e   : > { %3777 = vmatprep.subr.msk.bf16.mxu1 %vm1052_vm5, %v2144_v2 }
 0x915   : > { %3675 = vmatpush3.bf16.xpose.msra.mxu1 %v2154_v3 }
 0x91c   : > { %3677 = vmatmul.mubr.msk.bf16.vlgmr.msra.gmra.mxu1 %vm1052_vm5, %v2142_v5 }
 0x98c   : > { %v4571_v6 = vpop.f32.mrf.mxu0 }
 0x98e   : > { %v4573_v7 = vpop.f32.mrf.mxu0 }
 0x990   : > { %v3655_v8 = vpop.f32.mrf.mxu0 }
 0x992   : > { %v4575_v9 = vpop.f32.mrf.mxu0 }
 0x993   : > { %v3825_v15 = vpack.i.bf16 %v4575_v9, %v4573_v7 }
 0x9be   : > { %v3670_v19 = vpop.f32.mrf.mxu0 }
 0x9bf   : > { %v2209_v22 = vmul.f32 0.35355338, %v3670_v19 }
 0x9c0   : > { %v2125_v20 = vpop.f32.mrf.mxu0 }
 0x9c1   : > { %v2207_v23 = vmul.f32 0.35355338, %v2125_v20  ;;  %v2215_v29 = vadd.f32 %v2209_v22, %v4335_v21 }
 0x9c2   : > { %v3671_v24 = vpop.f32.mrf.mxu0 }
 0x9c3   : > { %v2213_v25 = vadd.f32 %v2207_v23, %v4335_v21  ;;  %v2225_v31 = vsel %vm1191_vm7, %v2215_v29, -inf }
 0x9c4   : > { %v2128_v26 = vpop.f32.mrf.mxu0 }
 0x9c5   : > { %v2208_v27 = vmul.f32 0.35355338, %v2128_v26  ;;  %v2219_v28 = vsel %vm1191_vm7, %v2213_v25, -inf }
 0x9c6   : > { %2220 = vmax.xlane.f32.xlu0 %v2219_v28 }
 0x9c7   : > { %v2214_v30 = vadd.f32 %v2208_v27, %v4335_v21 }
 0x9c9   : > { %v2222_v32 = vsel %vm1191_vm7, %v2214_v30, -inf }
 0x9ca   : > { %2226 = vmax.xlane.f32.xlu0 %v2225_v31  ;;  %2223 = vmax.xlane.f32.xlu1 %v2222_v32 }
 0x9cc   : > { %v4585_v33 = vpop.f32.mrf.mxu1 }
 0x9ce   : > { %v4587_v34 = vpop.f32.mrf.mxu1 }
 0x9d0   : > { %v3663_v36 = vpop.f32.mrf.mxu1 }
 0x9d2   : > { %v4589_v37 = vpop.f32.mrf.mxu1 }
 0x9d3   : > { %v3855_v38 = vpack.i.bf16 %v4585_v33, %v4589_v37 }
 0x9dc   : > { %v3678_v39 = vpop.f32.mrf.mxu1 }
 0x9dd   : > { %v2212_v41 = vmul.f32 0.35355338, %v3678_v39 }
 0x9de   : > { %v2193_v40 = vpop.f32.mrf.mxu1 }
 0x9df   : > { %v2210_v42 = vmul.f32 0.35355338, %v2193_v40  ;;  %v2218_v48 = vadd.f32 %v2212_v41, %v4335_v21 }
 0x9e0   : > { %v3679_v43 = vpop.f32.mrf.mxu1 }
 0x9e1   : > { %v2216_v44 = vadd.f32 %v2210_v42, %v4335_v21  ;;  %v2234_v52 = vsel %vm1191_vm7, %v2218_v48, -inf }
 0x9e2   : > { %v2196_v45 = vpop.f32.mrf.mxu1 }
 0x9e3   : > { %v2211_v46 = vmul.f32 0.35355338, %v2196_v45  ;;  %v2228_v47 = vsel %vm1191_vm7, %v2216_v44, -inf }
 0x9e4   : > { %2229 = vmax.xlane.f32.xlu0 %v2228_v47 }
 0x9e5   : > { %v2217_v49 = vadd.f32 %v2211_v46, %v4335_v21 }
 0x9e7   : > { %v2231_v56 = vsel %vm1191_vm7, %v2217_v49, -inf }
 0x9e8   : > { %2235 = vmax.xlane.f32.xlu0 %v2234_v52  ;;  %2232 = vmax.xlane.f32.xlu1 %v2231_v56 }
 0xa4f   : > { %v2221_v60 = vpop.xlane.xlu0 %2220 }
 0xa50   : > { %v2237_v61 = vsub.f32 %v2213_v25, %v2221_v60 }
 0xa52   : > { %v2243_v62 = vmul.f32 1.442695, %v2237_v61 }
 0xa53   : > { %v2227_v63 = vpop.xlane.xlu0 %2226  ;;  %v2224_v1 = vpop.xlane.xlu1 %2223 }
 0xa54   : > { %3947 = vpow2.f32 %v2243_v62  ;;  %v2239_v2 = vsub.f32 %v2215_v29, %v2227_v63  ;;  %v2238_v3 = vsub.f32 %v2214_v30, %v2224_v1 }
 0xa56   : > { %v2247_v5 = vmul.f32 1.442695, %v2239_v2  ;;  %v2245_v8 = vmul.f32 1.442695, %v2238_v3 }
 0xa58   : > { %3949 = vpow2.f32 %v2247_v5 }
 0xa59   : > { %3951 = vpow2.f32 %v2245_v8 }
 0xa61   : > { %v3948_v19 = vpop.eup %3947 }
 0xa62   : > { %v2255_v21 = vsel %vm1191_vm7, %v3948_v19, 0.0 }
 0xa63   : > { %2256 = vadd.xlane.f32.xlu1 %v2255_v21  ;;  %v3867_v21 = vld [vmem:[%s4205_s0 + $0x8] sm:$0xff]  }
 0xa65   : > { %v3950_v20 = vpop.eup %3949 }
 0xa66   : > { %v3952_v22 = vpop.eup %3951  ;;  %v2261_v23 = vsel %vm1191_vm7, %v3950_v20, 0.0 }
 0xa67   : > { %2262 = vadd.xlane.f32.xlu1 %v2261_v23  ;;  %v2258_v24 = vsel %vm1191_vm7, %v3952_v22, 0.0 }
 0xa68   : > { %2259 = vadd.xlane.f32.xlu0 %v2258_v24 }
 0xa6d   : > { %v2230_v25 = vpop.xlane.xlu0 %2229 }
 0xa6e   : > { %v2240_v26 = vsub.f32 %v2216_v44, %v2230_v25 }
 0xa70   : > { %v2249_v29 = vmul.f32 1.442695, %v2240_v26 }
 0xa71   : > { %v2236_v27 = vpop.xlane.xlu0 %2235  ;;  %v2233_v32 = vpop.xlane.xlu1 %2232 }
 0xa72   : > { %v2242_v28 = vsub.f32 %v2218_v48, %v2236_v27  ;;  %v2241_v40 = vsub.f32 %v2217_v49, %v2233_v32  ;;  %v3840_v27 = vpack.i.bf16 %v4587_v34, %v4571_v6 }
 0xa74   : > { %v2253_v30 = vmul.f32 1.442695, %v2242_v28  ;;  %v2251_v42 = vmul.f32 1.442695, %v2241_v40 }
 0xa76   : > { %3953 = vpow2.f32 %v2253_v30 }
 0xa77   : > { %3955 = vpow2.f32 %v2249_v29 }
 0xa78   : > { %2291 = vrot.lane.b32.xlu1 %v4311_v57, %s4066_s17  ;;  %3957 = vpow2.f32 %v2251_v42 }
 0xa7c   : > { %2353 = vrot.lane.b32.xlu1 %v4319_v4, %s4066_s17 }
 0xa83   : > { %v4604_v31 = vpop.eup %3953 }
 0xa84   : > { %v2270_v36 = vsel %vm1191_vm7, %v4604_v31, 0.0  ;;  %v3956_v39 = vpop.eup %3955 }
 0xa85   : > { %2271 = vadd.xlane.f32.xlu0 %v2270_v36  ;;  %v2264_v41 = vsel %vm1191_vm7, %v3956_v39, 0.0  ;;  %v3958_v43 = vpop.eup %3957 }
 0xa86   : > { %v2267_v57 = vsel %vm1191_vm7, %v3958_v43, 0.0 }
 0xa89   : > { %2265 = vadd.xlane.f32.xlu0 %v2264_v41 }
 0xa9f   : > { %2289 = vrot.lane.b32.xlu0 %v4307_v53, %s4066_s17  ;;  %v3835_v53 = vpack.i.bf16 %v4497_v11, %v4481_v50 }
 0xaa0   : > { %2268 = vadd.xlane.f32.xlu1 %v2267_v57 }
 0xaa3   : > { %3821 = vrot.lane.b32.xlu0 %v3820_v55, %s4067_s3 }
 0xab1   : > { %2351 = vrot.lane.b32.xlu1 %v4315_v0, %s4066_s17  ;;  %s4892_s17 = scalar_lea.vmem %s4853_s9, %s4190_s23 }
 0xab5   : > { %3826 = vrot.lane.b32.xlu1 %v3825_v15, %s4068_s19 }
 0xab9   : > { %3836 = vrot.lane.b32.xlu1 %v3835_v53, %s4067_s3 }
 0xaec   : > { %v2257_v4 = vpop.xlane.xlu1 %2256 }
 0xaed   : > { %3959 = vrcp.f32 %v2257_v4 }
 0xaf0   : > { %v2263_v44 = vpop.xlane.xlu1 %2262 }
 0xaf1   : > { %v2260_v45 = vpop.xlane.xlu0 %2259 }
 0xaf2   : > { %3961 = vrcp.f32 %v2260_v45 }
 0xaf3   : > { %3963 = vrcp.f32 %v2263_v44 }
 0xaf4   : > { %v2292_v51 = vpop.permute.xlu1 %2291 }
 0xaf5   : > { %v2301_v54 = vsel %vm1273_vm8, %v2292_v51, 0  ;;  %3778 = vmatprep.subr.msk.bf16.mxu0 %vm1273_vm8, %v2292_v51 }
 0xaf6   : > { %3681 = vmatpush3.bf16.msra.mxu0 %v2301_v54 }
 0xaf8   : > { %v2354_v0 = vpop.permute.xlu1 %2353 }
 0xaf9   : > { %v2363_v55 = vsel %vm1273_vm8, %v2354_v0, 0  ;;  %3779 = vmatprep.subr.msk.bf16.mxu1 %vm1273_vm8, %v2354_v0 }
 0xafa   : > { %3689 = vmatpush3.bf16.msra.mxu1 %v2363_v55  ;;  %v3960_v50 = vpop.eup %3959 }
 0xafb   : > { %v2279_v7 = vmul.f32 %v3960_v50, %v3948_v19 }
 0xaff   : > { %v3962_v11 = vpop.eup %3961 }
 0xb00   : > { %v2280_v9 = vmul.f32 %v3962_v11, %v3952_v22  ;;  %v3964_v47 = vpop.eup %3963 }
 0xb01   : > { %v2281_v49 = vmul.f32 %v3964_v47, %v3950_v20  ;;  %v3868_v20 = vld [vmem:[%s4205_s0] sm:$0xff]  }
 0xb02   : > { %v2285_v15 = vpack.c.bf16 %v2280_v9, %v2279_v7 }
 0xb03   : > { %v2286_v56 = vpack.c.bf16 %v2281_v49, %v2281_v49 }
 0xb04   : > { %3684 = vmatprep.mubr.msk.bf16.mxu0 %vm1191_vm7, %v2285_v15 }
 0xb0e   : > { %v2272_v46 = vpop.xlane.xlu0 %2271 }
 0xb0f   : > { %3965 = vrcp.f32 %v2272_v46 }
 0xb12   : > { %v2266_v48 = vpop.xlane.xlu0 %2265 }
 0xb13   : > { %3967 = vrcp.f32 %v2266_v48 }
 0xb16   : > { %v2290_v52 = vpop.permute.xlu0 %2289 }
 0xb17   : > { %3682 = vmatprep.subr.bf16.mxu0 %v2290_v52 }
 0xb18   : > { %3683 = vmatpush3.bf16.msra.mxu0 %v2290_v52 }
 0xb19   : > { %3696 = vmatprep.subr.bf16.mxu0 %v4053_v35 }
 0xb1a   : > { %v3822_v6 = vpop.permute.xlu0 %3821 }
 0xb1b   : > { %3685 = vmatmul.mubr.msk.bf16.vlgmr.msra.gmra.mxu0 %vm1191_vm7, %v2286_v56  ;;  %v3823_v40 = vunpack.i.l.bf16 %v3822_v6 }
 0xb1c   : > { %3700 = vmatprep.mubr.msk.bf16.mxu0 %vm4054_vm3, %v4053_v35  ;;  %v3966_v62 = vpop.eup %3965  ;;  %3697 = vmatpush3.bf16.msra.mxu0 %v3867_v21 }
 0xb1d   : > { %v2284_v2 = vmul.f32 %v3966_v62, %v4604_v31  ;;  %3698 = vmatprep.subr.bf16.mxu0 %v4053_v35  ;;  %v2485_v42 = vsel %vm1052_vm5, %v4397_v59, %v3823_v40 }
 0xb1f   : > { %v2288_v19 = vpack.c.bf16 %v2284_v2, %v2284_v2 }
 0xb20   : > { %v3968_v63 = vpop.eup %3967  ;;  %3699 = vmatpush3.bf16.msra.mxu0 %v3868_v20 }
 0xb21   : > { %v2282_v3 = vmul.f32 %v3968_v63, %v3956_v39  ;;  %3728 = vmatprep.subr.bf16.mxu0 %v4053_v35  ;;  %v3824_v39 = vunpack.i.h.bf16 %v3822_v6 }
 0xb29   : > { %v2269_v60 = vpop.xlane.xlu1 %2268 }
 0xb2a   : > { %3969 = vrcp.f32 %v2269_v60 }
 0xb2d   : > { %v2352_v61 = vpop.permute.xlu1 %2351 }
 0xb2e   : > { %3690 = vmatprep.subr.bf16.mxu1 %v2352_v61 }
 0xb2f   : > { %3691 = vmatpush3.bf16.msra.mxu1 %v2352_v61 }
 0xb30   : > { %3712 = vmatprep.subr.bf16.mxu1 %v4053_v35 }
 0xb31   : > { %v3827_v34 = vpop.permute.xlu1 %3826 }
 0xb32   : > { %v3829_v41 = vunpack.i.h.bf16 %v3827_v34  ;;  %v3828_v10 = vunpack.i.l.bf16 %v3827_v34  ;;  %v4009_v34 = vld [vmem:[#allocation2 + $0x10] sm:$0xff] }
 0xb34   : > { %v2492_v37 = vsel %vm2491_vm9, %v2485_v42, %v3828_v10 }
 0xb35   : > { %v3837_v44 = vpop.permute.xlu1 %3836 }
 0xb36   : > { %v3839_v45 = vunpack.i.h.bf16 %v3837_v44  ;;  %v3838_v59 = vunpack.i.l.bf16 %v3837_v44 }
 0xb37   : > { %v3970_v1 = vpop.eup %3969 }
 0xb38   : > { %v2283_v5 = vmul.f32 %v3970_v1, %v3958_v43  ;;  %v2488_v50 = vsel %vm1052_vm5, %v4409_v14, %v3839_v45  ;;  %v2487_v11 = vsel %vm1052_vm5, %v4395_v58, %v3838_v59  ;;  %v4012_v59 = vld [vmem:[#allocation2 + $0x28] sm:$0xff] }
 0xb3a   : > { %v2287_v8 = vpack.c.bf16 %v2283_v5, %v2282_v3 }
 0xb3c   : > { %3692 = vmatprep.mubr.msk.bf16.mxu1 %vm1191_vm7, %v2287_v8 }
 0xb3d   : > { %3693 = vmatmul.mubr.msk.bf16.vlgmr.msra.gmra.mxu1 %vm1191_vm7, %v2288_v19 }
 0xb3e   : > { %3716 = vmatprep.mubr.msk.bf16.mxu1 %vm4054_vm3, %v4053_v35 }
 0xbdb   : > { %v3686_v22 = vpop.f32.mrf.mxu0 }
 0xbdd   : > { %v2337_v23 = vpop.f32.mrf.mxu0 }
 0xbdf   : > { %v3687_v24 = vpop.f32.mrf.mxu0 }
 0xbe1   : > { %v2340_v25 = vpop.f32.mrf.mxu0 }
 0xbe2   : > { %v3830_v26 = vpack.i.bf16 %v2340_v25, %v2337_v23  ;;  %v4007_v23 = vld [vmem:[#allocation2] sm:$0xff] }
 0xbe4   : > { %3831 = vrot.lane.b32.xlu0 %v3830_v26, %s4069_s27 }
 0xbe8   : > { %3841 = vrot.lane.b32.xlu0 %v3840_v27, %s4068_s19 }
 0xbec   : > { %3851 = vrot.lane.b32.xlu0 %v3850_v18, %s4067_s3  ;;  %v2486_v18 = vsel %vm1052_vm5, %v4405_v12, %v3824_v39 }
 0xbed   : > { %v2493_v33 = vsel %vm2491_vm9, %v2486_v18, %v3829_v41  ;;  %v4010_v18 = vld [vmem:[#allocation2 + $0x18] sm:$0xff] }
 0xbfd   : > { %v3694_v28 = vpop.f32.mrf.mxu1 }
 0xbff   : > { %v2399_v29 = vpop.f32.mrf.mxu1 }
 0xc00   : > { %v3845_v30 = vpack.i.bf16 %v2399_v29, %v3686_v22  ;;  %v4008_v29 = vld [vmem:[#allocation2 + $0x8] sm:$0xff] }
 0xc01   : > { %v3695_v31 = vpop.f32.mrf.mxu1 }
 0xc02   : > { %3846 = vrot.lane.b32.xlu1 %v3845_v30, %s4069_s27 }
 0xc03   : > { %v2402_v32 = vpop.f32.mrf.mxu1 }
 0xc04   : > { %v3860_v36 = vpack.i.bf16 %v3694_v28, %v2402_v32 }
 0xc06   : > { %3856 = vrot.lane.b32.xlu1 %v3855_v38, %s4068_s19  ;;  %3861 = vrot.lane.b32.xlu0 %v3860_v36, %s4069_s27  ;;  %s4893_s27 = scalar_lea.vmem %s4855_s11, %s4190_s23 }
 0xc56   : > { %v3832_v17 = vpop.permute.xlu0 %3831 }
 0xc57   : > { %v3834_v43 = vunpack.i.h.bf16 %v3832_v17  ;;  %v3833_v57 = vunpack.i.l.bf16 %v3832_v17 }
 0xc59   : > { %v2498_v38 = vsel %vm1191_vm7, %v2492_v37, %v3833_v57  ;;  %v2499_v53 = vsel %vm1191_vm7, %v2493_v33, %v3834_v43 }
 0xc5a   : > { %v2504_v4 = vpack.c.bf16 %v2499_v53, %v2498_v38  ;;  %v3842_v12 = vpop.permute.xlu0 %3841  ;;  %v4011_v38 = vld [vmem:[#allocation2 + $0x20] sm:$0xff] }
 0xc5b   : > { %v3844_v51 = vunpack.i.h.bf16 %v3842_v12  ;;  %v3843_v54 = vunpack.i.l.bf16 %v3842_v12 }
 0xc5c   : > { %3701 = vmatmul.mubr.msk.bf16.vlgmr.msra.gmra.mxu0 %vm971_vm4, %v2504_v4 }
 0xc5d   : > { %3704 = vmatprep.mubr.msk.bf16.mxu0 %vm4054_vm3, %v4053_v35  ;;  %v2494_v15 = vsel %vm2491_vm9, %v2487_v11, %v3843_v54  ;;  %v2495_v46 = vsel %vm2491_vm9, %v2488_v50, %v3844_v51 }
 0xc5e   : > { %v3852_v0 = vpop.permute.xlu0 %3851 }
 0xc5f   : > { %v3854_v47 = vunpack.i.h.bf16 %v3852_v0  ;;  %v3853_v48 = vunpack.i.l.bf16 %v3852_v0 }
 0xc61   : > { %v2490_v1 = vsel %vm1052_vm5, %v4407_v13, %v3854_v47  ;;  %v2489_v2 = vsel %vm1052_vm5, %v4411_v16, %v3853_v48  ;;  %v3406_v13 = vld [vmem:[%s4890_s6] ss:$0 sm:$0xff] }
 0xc74   : > { %v3847_v55 = vpop.permute.xlu1 %3846 }
 0xc75   : > { %v3849_v7 = vunpack.i.h.bf16 %v3847_v55  ;;  %v3848_v9 = vunpack.i.l.bf16 %v3847_v55 }
 0xc77   : > { %v2500_v49 = vsel %vm1191_vm7, %v2494_v15, %v3848_v9  ;;  %v2501_v52 = vsel %vm1191_vm7, %v2495_v46, %v3849_v7 }
 0xc78   : > { %v2505_v56 = vpack.c.bf16 %v2501_v52, %v2500_v49  ;;  %v3862_v60 = vpop.permute.xlu0 %3861  ;;  %v3857_v61 = vpop.permute.xlu1 %3856 }
 0xc79   : > { %v3864_v14 = vunpack.i.h.bf16 %v3862_v60  ;;  %v3863_v62 = vunpack.i.l.bf16 %v3862_v60  ;;  %v3859_v63 = vunpack.i.h.bf16 %v3857_v61  ;;  %v3858_v58 = vunpack.i.l.bf16 %v3857_v61 }
 0xc7a   : > { %3705 = vmatmul.mubr.msk.bf16.gmra.mxu0 %vm971_vm4, %v2505_v56 }
 0xc7b   : > { %v2497_v3 = vsel %vm2491_vm9, %v2490_v1, %v3859_v63  ;;  %v2496_v5 = vsel %vm2491_vm9, %v2489_v2, %v3858_v58  ;;  %3708 = vmatprep.mubr.msk.bf16.mxu0 %vm4054_vm3, %v4053_v35 }
 0xc7c   : > { %v2502_v8 = vsel %vm1191_vm7, %v2496_v5, %v3863_v62  ;;  %v2503_v19 = vsel %vm1191_vm7, %v2497_v3, %v3864_v14  ;;  %v3869_v3 = vld [vmem:[%s4222_s28 + $0x8] sm:$0xff]  }
 0xc7d   : > { %v2506_v21 = vpack.c.bf16 %v2503_v19, %v2502_v8  ;;  %3713 = vmatpush3.bf16.msra.mxu1 %v3869_v3 }
 0xc7e   : > { %3714 = vmatprep.subr.bf16.mxu1 %v4053_v35 }
 0xc82   : > { %3709 = vmatmul.mubr.msk.bf16.gmra.mxu0 %vm971_vm4, %v2506_v21  ;;  %v3870_v21 = vld [vmem:[%s4222_s28] sm:$0xff]  }
 0xc83   : > { %3736 = vmatprep.mubr.msk.bf16.mxu0 %vm4054_vm3, %v4053_v35  ;;  %3715 = vmatpush3.bf16.msra.mxu1 %v3870_v21 }
 0xd1c   : > { %v2573_v16 = vpop.f32.mrf.mxu0 }
 0xd1d   : > { %v2574_v20 = vadd.f32 %v3406_v13, %v2573_v16 }
 0xd1e   : > { %v3702_v22 = vpop.f32.mrf.mxu0 }
 0xd1f   : > { %v2596_v24 = vadd.f32 %v4007_v23, %v2574_v20 }
 0xd20   : > { %v2576_v25 = vpop.f32.mrf.mxu0 }
 0xd21   : > { %v2577_v26 = vadd.f32 %v3406_v13, %v2576_v25  ;;  %v2604_v27 = vsel %vm971_vm4, %v2596_v24, 0.0 }
 0xd22   : > { %2605 = vadd.xlane.f32.xlu1 %v2604_v27  ;;  %v3703_v28 = vpop.f32.mrf.mxu0 }
 0xd23   : > { %v2597_v30 = vadd.f32 %v4008_v29, %v2577_v26 }
 0xd25   : > { %v2607_v31 = vsel %vm971_vm4, %v2597_v30, 0.0 }
 0xd26   : > { %2608 = vadd.xlane.f32.xlu0 %v2607_v31 }
 0xd3a   : > { %v2581_v32 = vpop.f32.mrf.mxu0 }
 0xd3b   : > { %v2582_v36 = vadd.f32 %v3406_v13, %v2581_v32 }
 0xd3c   : > { %v3706_v6 = vpop.f32.mrf.mxu0 }
 0xd3d   : > { %v2598_v39 = vadd.f32 %v4009_v34, %v2582_v36  ;;  %v3412_v36 = vld [vmem:[%s4891_s4] ss:$0 sm:$0xff] }
 0xd3e   : > { %v2584_v40 = vpop.f32.mrf.mxu0 }
 0xd3f   : > { %v2585_v41 = vadd.f32 %v3406_v13, %v2584_v40  ;;  %v2610_v10 = vsel %vm971_vm4, %v2598_v39, 0.0  ;;  %v3413_v40 = vld [vmem:[%s4892_s17] ss:$0 sm:$0xff]  ;;  %s4895_s17 = sld [smem:[#allocation13_spill]] (!%p3430_p5) }
 0xd40   : > { %2611 = vadd.xlane.f32.xlu0 %v2610_v10  ;;  %v3707_v17 = vpop.f32.mrf.mxu0 }
 0xd41   : > { %v2599_v42 = vadd.f32 %v4010_v18, %v2585_v41 }
 0xd42   : > { %v2589_v43 = vpop.f32.mrf.mxu0 }
 0xd43   : > { %v2590_v57 = vadd.f32 %v3406_v13, %v2589_v43  ;;  %v2613_v33 = vsel %vm971_vm4, %v2599_v42, 0.0 }
 0xd44   : > { %2614 = vadd.xlane.f32.xlu1 %v2613_v33  ;;  %v3710_v37 = vpop.f32.mrf.mxu0 }
 0xd45   : > { %v2600_v53 = vadd.f32 %v4011_v38, %v2590_v57 }
 0xd46   : > { %v2592_v4 = vpop.f32.mrf.mxu0 }
 0xd47   : > { %v2593_v12 = vadd.f32 %v3406_v13, %v2592_v4  ;;  %v2616_v44 = vsel %vm971_vm4, %v2600_v53, 0.0 }
 0xd48   : > { %2617 = vadd.xlane.f32.xlu0 %v2616_v44  ;;  %v3711_v45 = vpop.f32.mrf.mxu0 }
 0xd49   : > { %v2601_v51 = vadd.f32 %v4012_v59, %v2593_v12 }
 0xd4b   : > { %v2619_v54 = vsel %vm971_vm4, %v2601_v51, 0.0 }
 0xd4c   : > { %2620 = vadd.xlane.f32.xlu1 %v2619_v54 }
 0xdab   : > { %v2606_v0 = vpop.xlane.xlu1 %2605 }
 0xdac   : > { %v2623_v55 = vmul.f32 0.03125, %v2606_v0 }
 0xdae   : > { %v2629_v50 = vsub.f32 %v2596_v24, %v2623_v55 }
 0xdaf   : > { %v2609_v11 = vpop.xlane.xlu0 %2608 }
 0xdb0   : > { %v2624_v7 = vmul.f32 0.03125, %v2609_v11  ;;  %v2635_v9 = vmul.f32 %v2629_v50, %v2629_v50 }
 0xdb2   : > { %v2630_v15 = vsub.f32 %v2597_v30, %v2624_v7  ;;  %v2641_v46 = vsel %vm971_vm4, %v2635_v9, 0.0 }
 0xdb3   : > { %2642 = vadd.xlane.f32.xlu0 %v2641_v46 }
 0xdb4   : > { %v2636_v47 = vmul.f32 %v2630_v15, %v2630_v15 }
 0xdb6   : > { %v2644_v48 = vsel %vm971_vm4, %v2636_v47, 0.0 }
 0xdb7   : > { %2645 = vadd.xlane.f32.xlu1 %v2644_v48 }
 0xdc9   : > { %v2612_v49 = vpop.xlane.xlu0 %2611 }
 0xdca   : > { %v2625_v52 = vmul.f32 0.03125, %v2612_v49 }
 0xdcc   : > { %v4699_v56 = vsub.f32 %v2598_v39, %v2625_v52 }
 0xdcd   : > { %v2615_v60 = vpop.xlane.xlu1 %2614 }
 0xdce   : > { %v2626_v61 = vmul.f32 0.03125, %v2615_v60  ;;  %v2637_v14 = vmul.f32 %v4699_v56, %v4699_v56 }
 0xdd0   : > { %v4703_v62 = vsub.f32 %v2599_v42, %v2626_v61  ;;  %v2647_v63 = vsel %vm971_vm4, %v2637_v14, 0.0 }
 0xdd1   : > { %2648 = vadd.xlane.f32.xlu0 %v2647_v63  ;;  %v2618_v58 = vpop.xlane.xlu0 %2617  ;;  %v3872_v63 = vld [vmem:[%s4232_s20 + $0x10] sm:$0xff]  }
 0xdd2   : > { %v2627_v1 = vmul.f32 0.03125, %v2618_v58  ;;  %v2638_v2 = vmul.f32 %v4703_v62, %v4703_v62  ;;  %v3873_v58 = vld [vmem:[%s4232_s20 + $0x8] sm:$0xff]  }
 0xdd4   : > { %v2633_v5 = vsub.f32 %v2600_v53, %v2627_v1  ;;  %v2650_v8 = vsel %vm971_vm4, %v2638_v2, 0.0  ;;  %v3874_v1 = vld [vmem:[%s4232_s20] sm:$0xff]  }
 0xdd5   : > { %2651 = vadd.xlane.f32.xlu1 %v2650_v8  ;;  %v2621_v19 = vpop.xlane.xlu1 %2620  ;;  %v3414_v2 = vld [vmem:[%s4893_s27] ss:$0 sm:$0xff]  ;;  %s4896_s27 = sld [smem:[#allocation14_spill]] (!%p3430_p5) }
 0xdd6   : > { %v2628_v13 = vmul.f32 0.03125, %v2621_v19  ;;  %v2639_v16 = vmul.f32 %v2633_v5, %v2633_v5 }
 0xdd8   : > { %v2634_v20 = vsub.f32 %v2601_v51, %v2628_v13  ;;  %v2653_v22 = vsel %vm971_vm4, %v2639_v16, 0.0 }
 0xdd9   : > { %2654 = vadd.xlane.f32.xlu0 %v2653_v22 }
 0xdda   : > { %v2640_v23 = vmul.f32 %v2634_v20, %v2634_v20 }
 0xddc   : > { %v2656_v24 = vsel %vm971_vm4, %v2640_v23, 0.0 }
 0xddd   : > { %2657 = vadd.xlane.f32.xlu1 %v2656_v24 }
 0xe3c   : > { %v2643_v25 = vpop.xlane.xlu0 %2642 }
 0xe3d   : > { %v2659_v26 = vmul.f32 0.03125, %v2643_v25 }
 0xe3f   : > { %v2665_v27 = vadd.f32 1e-05, %v2659_v26 }
 0xe40   : > { %v2646_v28 = vpop.xlane.xlu1 %2645 }
 0xe41   : > { %3971 = vrsqrt.f32 %v2665_v27  ;;  %v2660_v29 = vmul.f32 0.03125, %v2646_v28 }
 0xe43   : > { %v2666_v30 = vadd.f32 1e-05, %v2660_v29 }
 0xe45   : > { %3973 = vrsqrt.f32 %v2666_v30 }
 0xe4e   : > { %v3972_v31 = vpop.eup %3971 }
 0xe4f   : > { %v2677_v32 = vmul.f32 %v3972_v31, %v2629_v50 }
 0xe51   : > { %v2689_v39 = vmul.f32 %v3412_v36, %v2677_v32 }
 0xe52   : > { %v3974_v6 = vpop.eup %3973 }
 0xe53   : > { %v2678_v34 = vmul.f32 %v3974_v6, %v2630_v15  ;;  %v4724_v10 = vadd.f32 %v3413_v40, %v2689_v39 }
 0xe55   : > { %v2690_v41 = vmul.f32 %v3412_v36, %v2678_v34 }
 0xe57   : > { %v4726_v17 = vadd.f32 %v3413_v40, %v2690_v41 }
 0xe59   : > { %v2707_v18 = vpack.c.bf16 %v4726_v17, %v4724_v10 }
 0xe5a   : > { %v2649_v42 = vpop.xlane.xlu0 %2648 }
 0xe5b   : > { %v2661_v43 = vmul.f32 0.03125, %v2649_v42  ;;  %3717 = vmatmul.mubr.msk.bf16.vlgmr.msra.gmra.mxu1 %vm971_vm4, %v2707_v18 }
 0xe5c   : > { %3720 = vmatprep.mubr.msk.bf16.mxu1 %vm4054_vm3, %v4053_v35 }
 0xe5d   : > { %v2667_v57 = vadd.f32 1e-05, %v2661_v43 }
 0xe5e   : > { %v2652_v33 = vpop.xlane.xlu1 %2651 }
 0xe5f   : > { %3975 = vrsqrt.f32 %v2667_v57  ;;  %v2662_v37 = vmul.f32 0.03125, %v2652_v33 }
 0xe61   : > { %v2668_v38 = vadd.f32 1e-05, %v2662_v37 }
 0xe62   : > { %v2655_v53 = vpop.xlane.xlu0 %2654 }
 0xe63   : > { %3977 = vrsqrt.f32 %v2668_v38  ;;  %v2663_v4 = vmul.f32 0.03125, %v2655_v53 }
 0xe65   : > { %v2669_v12 = vadd.f32 1e-05, %v2663_v4 }
 0xe66   : > { %v2658_v44 = vpop.xlane.xlu1 %2657 }
 0xe67   : > { %3979 = vrsqrt.f32 %v2669_v12  ;;  %v2664_v45 = vmul.f32 0.03125, %v2658_v44 }
 0xe69   : > { %v2670_v59 = vadd.f32 1e-05, %v2664_v45 }
 0xe6b   : > { %3981 = vrsqrt.f32 %v2670_v59 }
 0xe6c   : > { %v3976_v51 = vpop.eup %3975 }
 0xe6d   : > { %v2679_v54 = vmul.f32 %v3976_v51, %v4699_v56 }
 0xe6f   : > { %v2691_v50 = vmul.f32 %v3412_v36, %v2679_v54 }
 0xe70   : > { %v3978_v0 = vpop.eup %3977 }
 0xe71   : > { %v2680_v55 = vmul.f32 %v3978_v0, %v4703_v62  ;;  %v4735_v9 = vadd.f32 %v3413_v40, %v2691_v50  ;;  %v3871_v62 = vld [vmem:[%s4232_s20 + $0x18] sm:$0xff]  }
 0xe72   : > { %3729 = vmatpush3.bf16.msra.mxu0 %v3871_v62 }
 0xe73   : > { %v2692_v11 = vmul.f32 %v3412_v36, %v2680_v55  ;;  %3730 = vmatprep.subr.bf16.mxu0 %v4053_v35 }
 0xe74   : > { %v3980_v7 = vpop.eup %3979 }
 0xe75   : > { %v4737_v15 = vadd.f32 %v3413_v40, %v2692_v11  ;;  %v2681_v46 = vmul.f32 %v3980_v7, %v2633_v5 }
 0xe76   : > { %3731 = vmatpush3.bf16.msra.mxu0 %v3872_v63 }
 0xe77   : > { %v2708_v47 = vpack.c.bf16 %v4737_v15, %v4735_v9  ;;  %v2693_v52 = vmul.f32 %v3412_v36, %v2681_v46  ;;  %3732 = vmatprep.subr.bf16.mxu0 %v4053_v35 }
 0xe78   : > { %v3982_v48 = vpop.eup %3981 }
 0xe79   : > { %3721 = vmatmul.mubr.msk.bf16.gmra.mxu1 %vm971_vm4, %v2708_v47  ;;  %v2682_v49 = vmul.f32 %v3982_v48, %v2634_v20  ;;  %v4744_v60 = vadd.f32 %v3413_v40, %v2693_v52 }
 0xe7a   : > { %3724 = vmatprep.mubr.msk.bf16.mxu1 %vm4054_vm3, %v4053_v35  ;;  %3733 = vmatpush3.bf16.msra.mxu0 %v3873_v58 }
 0xe7b   : > { %v2694_v56 = vmul.f32 %v3412_v36, %v2682_v49  ;;  %3734 = vmatprep.subr.bf16.mxu0 %v4053_v35 }
 0xe7d   : > { %v4746_v61 = vadd.f32 %v3413_v40, %v2694_v56 }
 0xe7e   : > { %3735 = vmatpush3.bf16.msra.mxu0 %v3874_v1 }
 0xe7f   : > { %v2709_v14 = vpack.c.bf16 %v4746_v61, %v4744_v60 }
 0xe81   : > { %3725 = vmatmul.mubr.msk.bf16.gmra.mxu1 %vm971_vm4, %v2709_v14  ;;  %v3420_v14 = vld [vmem:[%s781_s2] ss:$0 sm:$0xff]  ;;  %s4897_s2 = sld [smem:[#allocation16_spill]] (!%p3430_p5) }
 0xf1b   : > { %v2776_v3 = vpop.f32.mrf.mxu1 }
 0xf1c   : > { %v2777_v5 = vadd.f32 %v3414_v2, %v2776_v3 }
 0xf1d   : > { %v3718_v8 = vpop.f32.mrf.mxu1 }
 0xf1e   : > { %v2806_v19 = vmul.f32 0.70710677, %v2777_v5  ;;  %v2799_v25 = vmul.f32 0.5, %v2777_v5 }
 0xf1f   : > { %v2779_v21 = vpop.f32.mrf.mxu1 }
 0xf20   : > { %3983 = verf.f32 %v2806_v19  ;;  %v2780_v13 = vadd.f32 %v3414_v2, %v2779_v21 }
 0xf21   : > { %v3719_v16 = vpop.f32.mrf.mxu1 }
 0xf22   : > { %v2807_v20 = vmul.f32 0.70710677, %v2780_v13  ;;  %v2800_v26 = vmul.f32 0.5, %v2780_v13 }
 0xf24   : > { %3985 = verf.f32 %v2807_v20 }
 0xf2d   : > { %v3984_v22 = vpop.eup %3983 }
 0xf2e   : > { %v2818_v23 = vadd.f32 1.0, %v3984_v22 }
 0xf30   : > { %v2824_v28 = vmul.f32 %v2818_v23, %v2799_v25 }
 0xf31   : > { %v3986_v24 = vpop.eup %3985 }
 0xf32   : > { %v2819_v27 = vadd.f32 1.0, %v3986_v24 }
 0xf34   : > { %v2825_v29 = vmul.f32 %v2819_v27, %v2800_v26 }
 0xf36   : > { %v2830_v30 = vpack.c.bf16 %v2825_v29, %v2824_v28 }
 0xf38   : > { %3737 = vmatmul.mubr.msk.bf16.vlgmr.msra.gmra.mxu0 %vm2872_vm10, %v2830_v30 }
 0xf39   : > { %v2784_v31 = vpop.f32.mrf.mxu1  ;;  %3740 = vmatprep.mubr.msk.bf16.mxu0 %vm4054_vm3, %v4053_v35 }
 0xf3a   : > { %v2785_v32 = vadd.f32 %v3414_v2, %v2784_v31 }
 0xf3b   : > { %v3722_v36 = vpop.f32.mrf.mxu1 }
 0xf3c   : > { %v2808_v6 = vmul.f32 0.70710677, %v2785_v32  ;;  %v2801_v45 = vmul.f32 0.5, %v2785_v32 }
 0xf3d   : > { %v2787_v34 = vpop.f32.mrf.mxu1 }
 0xf3e   : > { %3987 = verf.f32 %v2808_v6  ;;  %v2788_v39 = vadd.f32 %v3414_v2, %v2787_v34 }
 0xf3f   : > { %v3723_v40 = vpop.f32.mrf.mxu1 }
 0xf40   : > { %v2809_v41 = vmul.f32 0.70710677, %v2788_v39  ;;  %v2802_v59 = vmul.f32 0.5, %v2788_v39 }
 0xf41   : > { %v2792_v18 = vpop.f32.mrf.mxu1 }
 0xf42   : > { %3989 = verf.f32 %v2809_v41  ;;  %v2793_v42 = vadd.f32 %v3414_v2, %v2792_v18 }
 0xf43   : > { %v3726_v43 = vpop.f32.mrf.mxu1 }
 0xf44   : > { %v2810_v57 = vmul.f32 0.70710677, %v2793_v42  ;;  %v2803_v46 = vmul.f32 0.5, %v2793_v42 }
 0xf45   : > { %v2795_v33 = vpop.f32.mrf.mxu1 }
 0xf46   : > { %3991 = verf.f32 %v2810_v57  ;;  %v2796_v37 = vadd.f32 %v3414_v2, %v2795_v33 }
 0xf47   : > { %v3727_v38 = vpop.f32.mrf.mxu1 }
 0xf48   : > { %v2811_v53 = vmul.f32 0.70710677, %v2796_v37  ;;  %v2804_v47 = vmul.f32 0.5, %v2796_v37 }
 0xf4a   : > { %3993 = verf.f32 %v2811_v53 }
 0xf4b   : > { %v3988_v4 = vpop.eup %3987 }
 0xf4c   : > { %v2820_v12 = vadd.f32 1.0, %v3988_v4 }
 0xf4e   : > { %v2826_v54 = vmul.f32 %v2820_v12, %v2801_v45 }
 0xf4f   : > { %v3990_v44 = vpop.eup %3989 }
 0xf50   : > { %v2821_v51 = vadd.f32 1.0, %v3990_v44 }
 0xf52   : > { %v2827_v0 = vmul.f32 %v2821_v51, %v2802_v59 }
 0xf53   : > { %v3992_v55 = vpop.eup %3991 }
 0xf54   : > { %v2831_v50 = vpack.c.bf16 %v2827_v0, %v2826_v54  ;;  %v2822_v11 = vadd.f32 1.0, %v3992_v55 }
 0xf56   : > { %3741 = vmatmul.mubr.msk.bf16.gmra.mxu0 %vm2872_vm10, %v2831_v50  ;;  %v2828_v49 = vmul.f32 %v2822_v11, %v2803_v46 }
 0xf57   : > { %v3994_v7 = vpop.eup %3993  ;;  %3744 = vmatprep.mubr.msk.bf16.mxu0 %vm4054_vm3, %v4053_v35 }
 0xf58   : > { %v2823_v48 = vadd.f32 1.0, %v3994_v7 }
 0xf5a   : > { %v2829_v52 = vmul.f32 %v2823_v48, %v2804_v47 }
 0xf5c   : > { %v2832_v56 = vpack.c.bf16 %v2829_v52, %v2828_v49 }
 0xf5e   : > { %3745 = vmatmul.mubr.msk.bf16.gmra.mxu0 %vm2872_vm10, %v2832_v56 }
 0xff8   : > { %v2916_v62 = vpop.f32.mrf.mxu0 }
 0xff9   : > { %v2917_v63 = vadd.f32 %v3420_v14, %v2916_v62 }
 0xffa   : > { %v3738_v58 = vpop.f32.mrf.mxu0 }
 0xffb   : > { %v2939_v1 = vadd.f32 %v2917_v63, %v4724_v10 }
 0xffc   : > { %v2919_v2 = vpop.f32.mrf.mxu0 }
 0xffd   : > { %v2920_v35 = vadd.f32 %v3420_v14, %v2919_v2  ;;  %v2947_v3 = vsel %vm971_vm4, %v2939_v1, 0.0 }
 0xffe   : > { %2948 = vadd.xlane.f32.xlu0 %v2947_v3  ;;  %v3739_v5 = vpop.f32.mrf.mxu0 }
 0xfff   : > { %v2940_v8 = vadd.f32 %v2920_v35, %v4726_v17  ;;  %v3429_v35 = vld [vmem:[%s787_s16] ss:$0 sm:$0xff] }
0x1001   : > { %v2950_v19 = vsel %vm971_vm4, %v2940_v8, 0.0 }
0x1002   : > { %2951 = vadd.xlane.f32.xlu1 %v2950_v19 }
0x1016   : > { %v2924_v21 = vpop.f32.mrf.mxu0 }
0x1017   : > { %v2925_v13 = vadd.f32 %v3420_v14, %v2924_v21 }
0x1018   : > { %v3742_v16 = vpop.f32.mrf.mxu0 }
0x1019   : > { %v2941_v20 = vadd.f32 %v2925_v13, %v4735_v9 }
0x101a   : > { %v2927_v22 = vpop.f32.mrf.mxu0 }
0x101b   : > { %v2928_v23 = vadd.f32 %v3420_v14, %v2927_v22  ;;  %v2953_v10 = vsel %vm971_vm4, %v2941_v20, 0.0 }
0x101c   : > { %2954 = vadd.xlane.f32.xlu0 %v2953_v10  ;;  %v3743_v24 = vpop.f32.mrf.mxu0 }
0x101d   : > { %v2942_v25 = vadd.f32 %v2928_v23, %v4737_v15 }
0x101e   : > { %v2932_v26 = vpop.f32.mrf.mxu0 }
0x101f   : > { %v2933_v27 = vadd.f32 %v3420_v14, %v2932_v26  ;;  %v2956_v17 = vsel %vm971_vm4, %v2942_v25, 0.0 }
0x1020   : > { %2957 = vadd.xlane.f32.xlu1 %v2956_v17  ;;  %v3746_v28 = vpop.f32.mrf.mxu0 }
0x1021   : > { %v2943_v29 = vadd.f32 %v2933_v27, %v4744_v60 }
0x1022   : > { %v2935_v30 = vpop.f32.mrf.mxu0 }
0x1023   : > { %v2936_v31 = vadd.f32 %v3420_v14, %v2935_v30  ;;  %v2959_v9 = vsel %vm971_vm4, %v2943_v29, 0.0 }
0x1024   : > { %2960 = vadd.xlane.f32.xlu0 %v2959_v9  ;;  %v3747_v32 = vpop.f32.mrf.mxu0 }
0x1025   : > { %v2944_v36 = vadd.f32 %v2936_v31, %v4746_v61 }
0x1027   : > { %v2962_v6 = vsel %vm971_vm4, %v2944_v36, 0.0 }
0x1028   : > { %2963 = vadd.xlane.f32.xlu1 %v2962_v6 }
0x1087   : > { %v2949_v15 = vpop.xlane.xlu0 %2948 }
0x1088   : > { %v2965_v34 = vmul.f32 0.03125, %v2949_v15 }
0x108a   : > { %v2971_v39 = vsub.f32 %v2939_v1, %v2965_v34  ;;  %v3428_v1 = vld [vmem:[%s784_s26] ss:$0 sm:$0xff]  ;;  %s4894_s26 = sld [smem:[#allocation15_spill]] (!%p3430_p5) }
0x108b   : > { %v2952_v40 = vpop.xlane.xlu1 %2951 }
0x108c   : > { %v2966_v41 = vmul.f32 0.03125, %v2952_v40  ;;  %v2977_v18 = vmul.f32 %v2971_v39, %v2971_v39 }
0x108e   : > { %v2972_v42 = vsub.f32 %v2940_v8, %v2966_v41  ;;  %v2983_v60 = vsel %vm971_vm4, %v2977_v18, 0.0 }
0x108f   : > { %2984 = vadd.xlane.f32.xlu0 %v2983_v60 }
0x1090   : > { %v2978_v43 = vmul.f32 %v2972_v42, %v2972_v42 }
0x1092   : > { %v2986_v57 = vsel %vm971_vm4, %v2978_v43, 0.0 }
0x1093   : > { %2987 = vadd.xlane.f32.xlu1 %v2986_v57 }
0x10a5   : > { %v2955_v33 = vpop.xlane.xlu0 %2954 }
0x10a6   : > { %v2967_v37 = vmul.f32 0.03125, %v2955_v33 }
0x10a8   : > { %v2973_v61 = vsub.f32 %v2941_v20, %v2967_v37 }
0x10a9   : > { %v2958_v38 = vpop.xlane.xlu1 %2957 }
0x10aa   : > { %v2968_v53 = vmul.f32 0.03125, %v2958_v38  ;;  %v2979_v4 = vmul.f32 %v2973_v61, %v2973_v61 }
0x10ac   : > { %v2974_v12 = vsub.f32 %v2942_v25, %v2968_v53  ;;  %v2989_v44 = vsel %vm971_vm4, %v2979_v4, 0.0 }
0x10ad   : > { %2990 = vadd.xlane.f32.xlu0 %v2989_v44  ;;  %v2961_v45 = vpop.xlane.xlu0 %2960 }
0x10ae   : > { %v2969_v59 = vmul.f32 0.03125, %v2961_v45  ;;  %v2980_v51 = vmul.f32 %v2974_v12, %v2974_v12 }
0x10b0   : > { %v2975_v54 = vsub.f32 %v2943_v29, %v2969_v59  ;;  %v2992_v0 = vsel %vm971_vm4, %v2980_v51, 0.0 }
0x10b1   : > { %2993 = vadd.xlane.f32.xlu1 %v2992_v0  ;;  %v2964_v55 = vpop.xlane.xlu1 %2963 }
0x10b2   : > { %v2970_v50 = vmul.f32 0.03125, %v2964_v55  ;;  %v2981_v11 = vmul.f32 %v2975_v54, %v2975_v54 }
0x10b4   : > { %v2976_v7 = vsub.f32 %v2944_v36, %v2970_v50  ;;  %v2995_v46 = vsel %vm971_vm4, %v2981_v11, 0.0 }
0x10b5   : > { %2996 = vadd.xlane.f32.xlu0 %v2995_v46 }
0x10b6   : > { %v2982_v47 = vmul.f32 %v2976_v7, %v2976_v7 }
0x10b8   : > { %v2998_v48 = vsel %vm971_vm4, %v2982_v47, 0.0 }
0x10b9   : > { %2999 = vadd.xlane.f32.xlu1 %v2998_v48 }
0x1118   : > { %v2985_v49 = vpop.xlane.xlu0 %2984 }
0x1119   : > { %v3001_v52 = vmul.f32 0.03125, %v2985_v49 }
0x111b   : > { %v3007_v56 = vadd.f32 1e-05, %v3001_v52 }
0x111c   : > { %v2988_v14 = vpop.xlane.xlu1 %2987 }
0x111d   : > { %3995 = vrsqrt.f32 %v3007_v56  ;;  %v3002_v62 = vmul.f32 0.03125, %v2988_v14 }
0x111f   : > { %v3008_v63 = vadd.f32 1e-05, %v3002_v62 }
0x1121   : > { %3997 = vrsqrt.f32 %v3008_v63 }
0x112a   : > { %v3996_v58 = vpop.eup %3995 }
0x112b   : > { %v3019_v2 = vmul.f32 %v3996_v58, %v2971_v39 }
0x112d   : > { %v3031_v3 = vmul.f32 %v3428_v1, %v3019_v2 }
0x112e   : > { %v3998_v5 = vpop.eup %3997 }
0x112f   : > { %v3043_v8 = vadd.f32 %v3429_v35, %v3031_v3  ;;  %v3020_v19 = vmul.f32 %v3998_v5, %v2972_v42 }
0x1131   : > { %3049 = vst.msk [vmem:[#allocation2] sm:$0xff] %vm971_vm4, %v3043_v8  ;;  %v3032_v21 = vmul.f32 %v3428_v1, %v3020_v19 }
0x1133   : > { %v3044_v13 = vadd.f32 %v3429_v35, %v3032_v21 }
0x1135   : > { %3050 = vst.msk [vmem:[#allocation2 + $0x8] sm:$0xff] %vm971_vm4, %v3044_v13 }
0x1136   : > { %v2991_v16 = vpop.xlane.xlu0 %2990 }
0x1137   : > { %v3003_v20 = vmul.f32 0.03125, %v2991_v16 }
0x1139   : > { %v3009_v22 = vadd.f32 1e-05, %v3003_v20 }
0x113a   : > { %v2994_v23 = vpop.xlane.xlu1 %2993 }
0x113b   : > { %3999 = vrsqrt.f32 %v3009_v22  ;;  %v3004_v10 = vmul.f32 0.03125, %v2994_v23 }
0x113d   : > { %v3010_v24 = vadd.f32 1e-05, %v3004_v10 }
0x113e   : > { %v2997_v25 = vpop.xlane.xlu0 %2996 }
0x113f   : > { %4001 = vrsqrt.f32 %v3010_v24  ;;  %v3005_v26 = vmul.f32 0.03125, %v2997_v25 }
0x1141   : > { %v3011_v27 = vadd.f32 1e-05, %v3005_v26 }
0x1142   : > { %v3000_v17 = vpop.xlane.xlu1 %2999 }
0x1143   : > { %4003 = vrsqrt.f32 %v3011_v27  ;;  %v3006_v28 = vmul.f32 0.03125, %v3000_v17 }
0x1145   : > { %v3012_v29 = vadd.f32 1e-05, %v3006_v28 }
0x1147   : > { %4005 = vrsqrt.f32 %v3012_v29 }
0x1148   : > { %v4000_v30 = vpop.eup %3999 }
0x1149   : > { %v3021_v31 = vmul.f32 %v4000_v30, %v2973_v61 }
0x114b   : > { %v3033_v9 = vmul.f32 %v3428_v1, %v3021_v31 }
0x114c   : > { %v4002_v32 = vpop.eup %4001 }
0x114d   : > { %v3045_v36 = vadd.f32 %v3429_v35, %v3033_v9  ;;  %v3022_v6 = vmul.f32 %v4002_v32, %v2974_v12 }
0x114f   : > { %3051 = vst.msk [vmem:[#allocation2 + $0x10] sm:$0xff] %vm971_vm4, %v3045_v36  ;;  %v3034_v15 = vmul.f32 %v3428_v1, %v3022_v6 }
0x1150   : > { %v4004_v34 = vpop.eup %4003 }
0x1151   : > { %v3046_v39 = vadd.f32 %v3429_v35, %v3034_v15  ;;  %v3023_v40 = vmul.f32 %v4004_v34, %v2975_v54 }
0x1153   : > { %3052 = vst.msk [vmem:[#allocation2 + $0x18] sm:$0xff] %vm971_vm4, %v3046_v39  ;;  %v3035_v41 = vmul.f32 %v3428_v1, %v3023_v40 }
0x1154   : > { %v4006_v18 = vpop.eup %4005 }
0x1155   : > { %v3047_v42 = vadd.f32 %v3429_v35, %v3035_v41  ;;  %v3024_v60 = vmul.f32 %v4006_v18, %v2976_v7 }
0x1157   : > { %3053 = vst.msk [vmem:[#allocation2 + $0x20] sm:$0xff] %vm971_vm4, %v3047_v42  ;;  %v3036_v43 = vmul.f32 %v3428_v1, %v3024_v60  ;;  %3058 = sbr.rel (%p3430_p5) target bundleno = 4971 (0x136b), region = 108 }
0x1159   : > { %v3048_v57 = vadd.f32 %v3429_v35, %v3036_v43 }
0x115b   : > { %3054 = vst.msk [vmem:[#allocation2 + $0x28] sm:$0xff] %vm971_vm4, %v3048_v57 }
0x115c   : > { %v3059_v33 = vld [vmem:[#allocation2] sm:$0x1]  ;;  %v3060_v37 = vld [vmem:[#allocation2 + $0x18] sm:$0x1]  ;;  %vm3066_vm11 = vcmask 1041409   ;;  %vm3069_vm12 = vcmask 254976  }
0x115d   : > { %v3065_v61 = vrot.slane %v3060_v37, 7  ;;  %v4013_v11 = vld [vmem:[%s4894_s26 + $0x8] sm:$0xff]   ;;  %v4070_v7 = vmov 0.0   ;;  %vm4071_vm13 = vmmov 0   ;;  %v4014_v46 = vld [vmem:[%s4894_s26] sm:$0xff]   ;;  %vm3190_vm14 = vcmask 74752  }
0x115e   : > { %3748 = vmatprep.subr.bf16.mxu0 %v4070_v7  ;;  %3752 = vmatprep.mubr.msk.bf16.mxu0 %vm4071_vm13, %v4070_v7  ;;  %v3431_v56 = vld [vmem:[%s4895_s17] ss:$0 sm:$0xff] }
0x115f   : > { %v3067_v38 = vsel %vm3066_vm11, %v3065_v61, %v3059_v33  ;;  %3749 = vmatpush3.bf16.msra.mxu0 %v4013_v11  ;;  %v3432_v63 = vld [vmem:[%s4896_s27] ss:$0 sm:$0xff] }
0x1160   : > { %v3070_v53 = vsel %vm3069_vm12, %v3067_v38, 0.0  ;;  %3750 = vmatprep.subr.bf16.mxu0 %v4070_v7  ;;  %v3433_v22 = vld [vmem:[%s4897_s2] ss:$0 sm:$0xff] }
0x1161   : > { %3071 = vadd.xlane.f32.xlu0 %v3070_v53 }
0x1163   : > { %3751 = vmatpush3.bf16.msra.mxu0 %v4014_v46 }
0x11ea   : > { %v3072_v4 = vpop.xlane.xlu0 %3071 }
0x11eb   : > { %v3073_v12 = vmul.f32 0.03125, %v3072_v4 }
0x11ed   : > { %v3075_v44 = vrot.slane %v3073_v12, 1  ;;  %v3078_v45 = vsub.f32 %v3059_v33, %v3073_v12 }
0x11ef   : > { %v3079_v59 = vsub.f32 %v3060_v37, %v3075_v44  ;;  %v3080_v54 = vmul.f32 %v3078_v45, %v3078_v45 }
0x11f1   : > { %v3081_v51 = vmul.f32 %v3079_v59, %v3079_v59 }
0x11f3   : > { %v3084_v0 = vrot.slane %v3081_v51, 7 }
0x11f5   : > { %v3085_v55 = vsel %vm3066_vm11, %v3084_v0, %v3080_v54 }
0x11f6   : > { %v3087_v50 = vsel %vm3069_vm12, %v3085_v55, 0.0 }
0x11f7   : > { %3088 = vadd.xlane.f32.xlu0 %v3087_v50 }
0x1280   : > { %v3089_v47 = vpop.xlane.xlu0 %3088 }
0x1281   : > { %v3090_v48 = vmul.f32 0.03125, %v3089_v47 }
0x1283   : > { %v3091_v49 = vadd.f32 1e-05, %v3090_v48 }
0x1285   : > { %4015 = vrsqrt.f32 %v3091_v49 }
0x1292   : > { %v4016_v52 = vpop.eup %4015 }
0x1293   : > { %v3094_v14 = vrot.slane %v4016_v52, 1  ;;  %v3097_v62 = vmul.f32 %v4016_v52, %v3078_v45 }
0x1295   : > { %v3098_v58 = vmul.f32 %v3094_v14, %v3079_v59  ;;  %v3105_v1 = vmul.f32 %v3431_v56, %v3097_v62 }
0x1297   : > { %v3106_v2 = vmul.f32 %v3431_v56, %v3098_v58  ;;  %v3113_v35 = vadd.f32 %v3432_v63, %v3105_v1 }
0x1299   : > { %v3114_v3 = vadd.f32 %v3432_v63, %v3106_v2  ;;  %v3115_v5 = vpack.c.bf16 %v3113_v35, %v3113_v35 }
0x129b   : > { %v3116_v8 = vpack.c.bf16 %v3114_v3, %v3114_v3  ;;  %v3130_v21 = vunpack.c.l.b16 %v3115_v5 }
0x129d   : > { %v3131_v19 = vunpack.c.l.b16 %v3116_v8 }
0x129f   : > { %v3132_v13 = vrot.slane %v3131_v19, 7 }
0x12a1   : > { %v3133_v16 = vsel %vm3066_vm11, %v3132_v13, %v3130_v21 }
0x12a2   : > { %v3134_v20 = vpack.c.b16 %v3133_v16, %v3133_v16 }
0x12a4   : > { %3753 = vmatmul.mubr.msk.bf16.vlgmr.msra.gmra.mxu0 %vm971_vm4, %v3134_v20 }
0x1364   : > { %v3184_v23 = vpop.f32.mrf.mxu0 }
0x1365   : > { %v3185_v10 = vadd.f32 %v3433_v22, %v3184_v23 }
0x1366   : > { %v3754_v24 = vpop.f32.mrf.mxu0 }
0x1367   : > { %3191 = vst.msk [vmem:[#allocation3] sm:$0x3] %vm3190_vm14, %v3185_v10 }
0x1368   : > { %v3187_v25 = vpop.f32.mrf.mxu0 }
0x136a   : > { %v3755_v26 = vpop.f32.mrf.mxu0 }
0x136b PF: > { %p3784_p6 = scmp.eq.s32.totalorder %s4184_s22, 1  ;;  %s4072_s29 = smov [#allocation3]  }
0x136c   : > { %s3199_s6 = sshll.u32 %s4072_s29, 4  ;;  %s3200_s6 = int_to_ptr.vmem [resolvable:$true] %s3199_s6 }
0x136d   : > { %s4017_s28 = scalar_lea.vmem %s3200_s6, 32  ;;  %p4024_p10 = scmp.lt.s32.totalorder %s3200_s6, %s3200_s6 }
0x136e   : > { %p4018_p7 = scmp.ne.s32.totalorder %s3200_s6, %s4017_s28  ;;  %p4025_p11 = scmp.lt.s32.totalorder %s4017_s28, %s4017_s28 }
0x1370   : > { %p4019_p8 = pnand %p4018_p7, %p3784_p6  ;;  %p4026_p12 = por %p4025_p11, %p4024_p10 }
0x1372   : > { %p4020_p9 = pneg %p4019_p8 }
0x1374   : > { %p4027_p13 = pnand %p4026_p12, %p4020_p9 }
0x1376   : > { %4030 = shalt.err (!%p4027_p13)
}
0x1377   : > { %s4898_s30 = sld [smem:[#allocation17_spill]] }
0x137d   : > { %3781 = dma.vmem_to_hbm [thread:$0]  (%p3784_p6), %s3200_s6, 32, %s4898_s30, [#allocation4]  }
0x137e   : > { %4046 = dma.done.wait (%p3784_p6), [#allocation4], 32  }
0x137f   : > { %4048 = vsyncadd (%p3784_p6), [#allocation4], 4294967264 }
0x1380 PF: > { %s4899_s4 = sld [smem:[#allocation6_spill]] }
0x1386   : > { %s31_s1 = sadd.s32 1, %s4899_s4  }
0x1387   : > { %p28_p0 = scmp.ge.s32.totalorder %s31_s1, 4  }
0x1389   :  { %30 = sbr.rel (!%p28_p0) target bundleno = 13 (0xd), region = 168 }
0x138e   :  { %3212 = vsyncpa [#allocation4], 1 }
0x138f   :  { %3214 = vsyncpa [#allocation4 + $0x1], 1 }

</bundles_post_ra>
